<compile_context>
chip_gen: v7x
topology: tpu7x:2x2x1
jax: 0.10.0
libtpu: 0.0.40
codegen_flags: <defaults>
</compile_context>

<pallas_src>
import functools

import jax
import jax.numpy as jnp
from jax.experimental import pallas as pl
from jax.experimental.pallas import tpu as pltpu


# --------------------------------------------------------------------------- kernel

def _residual_unit_kernel(x_ref, halo_ref, w1_ref, b1_ref, w2_ref, b2_ref,
                          w3_ref, b3_ref, o_ref, h1p_ref):
    """Fused 1x1 -> ReLU -> 3x3 -> ReLU -> 1x1 -> +identity -> ReLU on one row tile.

    x_ref   : (1, TH, W, N)      f32 main tile rows
    halo_ref: (1, 1, 2, W, N)    f32 top/bottom halo rows (zeros outside the image)
    h1p_ref : (TH+2, W+2, C2)    f32 VMEM staging buffer for the W-zero-padded conv1 output
    o_ref   : (1, TH, W, N)      f32 output tile
    """
    _, TH, W, N = x_ref.shape
    C2 = w1_ref.shape[1]
    t = pl.program_id(1)
    last_t = pl.num_programs(1) - 1

    xt = x_ref[0]                                    # (TH, W, N)
    hl = halo_ref[0, 0]                              # (2,  W, N)

    # ---- conv1x1 + bias + ReLU over the 1-row-haloed window (halo rows recomputed) ----
    xwin = jnp.concatenate([hl[0:1], xt, hl[1:2]], axis=0)              # (TH+2, W, N)
    h1 = jnp.dot(xwin.reshape((TH + 2) * W, N).astype(jnp.bfloat16), w1_ref[...],
                 preferred_element_type=jnp.float32)
    h1 = jnp.maximum(h1 + b1_ref[...], 0.0).reshape(TH + 2, W, C2)

    # ---- stage into the W-zero-padded scratch (only the 2 border columns are zeroed) ----
    zcol = jnp.zeros((TH + 2, 1, C2), jnp.float32)
    h1p_ref[:, 0:1, :] = zcol
    h1p_ref[:, W + 1:W + 2, :] = zcol
    h1p_ref[:, 1:W + 1, :] = h1
    # PyTorch's conv3x3(padding=1) zero-pads the conv1 OUTPUT, so halo rows falling outside
    # the image must be exactly 0 (not relu(b1)).  Only the first/last row tile has such
    # rows -> scale just those two rows with a 0/1 scalar.
    top_ok = (t > 0).astype(jnp.float32)
    bot_ok = (t < last_t).astype(jnp.float32)
    h1p_ref[0:1, 1:W + 1, :] = h1[0:1] * top_ok
    h1p_ref[TH + 1:TH + 2, 1:W + 1, :] = h1[TH + 1:TH + 2] * bot_ok

    # ---- conv3x3 as ONE K=9*C2 matmul over a once-built im2col patch ----
    taps = [h1p_ref[di:di + TH, dj:dj + W, :].reshape(TH * W, C2)
            for di in range(3) for dj in range(3)]
    patch = jnp.concatenate(taps, axis=-1).astype(jnp.bfloat16)          # (TH*W, 9*C2)
    h2 = jnp.dot(patch, w2_ref[...], preferred_element_type=jnp.float32)
    h2 = jnp.maximum(h2 + b2_ref[...], 0.0)                              # (TH*W, C2)

    # ---- conv1x1 + bias + residual add + ReLU (fused epilogue, lane-dense N=128) ----
    out = (jnp.dot(h2.astype(jnp.bfloat16), w3_ref[...],
                   preferred_element_type=jnp.float32)
           + b3_ref[...] + xt.reshape(TH * W, N))
    o_ref[0] = jnp.maximum(out, 0.0).reshape(TH, W, N)


# --------------------------------------------------------------------------- tiling policy

def _vmem_policy():
    """Generation-aware (v5e/v6e/v7x) VMEM limit and per-tile budget."""
    cap = 128 * 1024 * 1024
    try:
        cap = int(getattr(pltpu.get_tpu_info(), "vmem_capacity_bytes", cap))
    except Exception:
        pass
    # v7x: 64 MiB physical -> 32 MiB limit; v5e/v6e: 128 MiB physical -> 64 MiB limit.
    vmem_limit = int(min(64 * 1024 * 1024, max(32 * 1024 * 1024, cap // 2)))
    tile_budget = vmem_limit // 2
    return vmem_limit, tile_budget


def _pick_tile_h(B, H, W, N, budget_bytes):
    """Largest row tile dividing H whose estimated VMEM footprint fits the budget."""
    C2 = N // 2

    def footprint(th):
        blocks = 4 * th * W * N * 4 + 4 * 2 * W * N * 4        # double-buffered in/out + halo
        inter = ((th + 2) * W * N * 6                           # xwin f32 + bf16 copy
                 + (th + 2) * W * C2 * 4                        # h1 f32
                 + (th + 2) * (W + 2) * C2 * 4                  # h1p scratch f32
                 + th * W * 9 * C2 * 6                          # im2col taps f32 + bf16
                 + th * W * C2 * 6                              # h2 f32 + bf16
                 + th * W * N * 4)                              # epilogue f32
        weights = 2 * ((N * C2 + 9 * C2 * C2 + C2 * N) * 2 + (2 * C2 + N) * 4)
        return blocks + inter + weights + (2 << 20)             # compiler-scratch slack

    fitting = [th for th in range(1, H + 1)
               if H % th == 0 and footprint(th) <= budget_bytes]
    if not fitting:
        return 1
    best = max(fitting)
    # v7x has 2 TensorCores: when B == 1 keep >= 2 row tiles so both cores get work,
    # unless that would shrink the tile below ~1/4 of the best fitting size.
    if B == 1 and best == H:
        smaller = [th for th in fitting if th < H]
        if smaller and 4 * max(smaller) >= best:
            best = max(smaller)
    return best


# --------------------------------------------------------------------------- wrapper

def residual_unit(x, params, tile_h=None):
    """x: (B, H, W, N) NHWC f32.  Returns (B, H, W, N) f32."""
    B, H, W, N = x.shape
    C2 = N // 2
    vmem_limit, tile_budget = _vmem_policy()
    TH = tile_h if tile_h is not None else _pick_tile_h(B, H, W, N, tile_budget)
    # TODO(synk): support H % TH != 0 with a masked tail tile instead of an exact divisor.
    assert H % TH == 0, (H, TH)
    T = H // TH

    # Tiny side array holding only the 1-row top/bottom halos of every row tile
    # (zeros outside the image): ~2/TH of the activation in extra HBM traffic instead of
    # a fully padded + stacked copy of x.
    zrow = jnp.zeros((B, 1, W, N), x.dtype)
    if T > 1:
        top = jnp.concatenate([zrow, x[:, TH - 1:H - 1:TH]], axis=1)    # rows t*TH - 1
        bot = jnp.concatenate([x[:, TH:H:TH], zrow], axis=1)            # rows t*TH + TH
    else:
        top, bot = zrow, zrow
    halo = jnp.stack([top, bot], axis=2)                                # (B, T, 2, W, N)

    # bf16 weights for the MXU (f32 accumulation); biases stay f32.
    w1 = params["w1"].astype(jnp.bfloat16)
    w2 = params["w2"].reshape(9 * C2, C2).astype(jnp.bfloat16)          # fused-tap layout
    w3 = params["w3"].astype(jnp.bfloat16)

    out = pl.pallas_call(
        _residual_unit_kernel,
        out_shape=jax.ShapeDtypeStruct((B, H, W, N), jnp.float32),
        grid=(B, T),
        in_specs=[
            pl.BlockSpec((1, TH, W, N), lambda b, t: (b, t, 0, 0)),      # x row tile
            pl.BlockSpec((1, 1, 2, W, N), lambda b, t: (b, t, 0, 0, 0)),  # halo rows
            pl.BlockSpec((N, C2), lambda b, t: (0, 0)),                  # w1 (VMEM-resident)
            pl.BlockSpec((1, C2), lambda b, t: (0, 0)),                  # b1
            pl.BlockSpec((9 * C2, C2), lambda b, t: (0, 0)),             # w2 fused taps
            pl.BlockSpec((1, C2), lambda b, t: (0, 0)),                  # b2
            pl.BlockSpec((C2, N), lambda b, t: (0, 0)),                  # w3
            pl.BlockSpec((1, N), lambda b, t: (0, 0)),                   # b3
        ],
        out_specs=pl.BlockSpec((1, TH, W, N), lambda b, t: (b, t, 0, 0)),
        scratch_shapes=[pltpu.VMEM((TH + 2, W + 2, C2), jnp.float32)],
        compiler_params=pltpu.CompilerParams(
            dimension_semantics=("parallel", "parallel"),   # megacore sharding on v7x
            vmem_limit_bytes=vmem_limit,
        ),
    )(x, halo, w1, params["b1"], w2, params["b2"], w3, params["b3"])
    return out


# --------------------------------------------------------------------------- reference

def residual_unit_ref(x, p):
    """Pure-JAX reference (NHWC), same weight layout as the kernel, all-f32."""
    C2 = p["w1"].shape[1]
    h = jax.nn.relu(jnp.einsum("bhwc,cd->bhwd", x, p["w1"]) + p["b1"])
    w2 = p["w2"].reshape(3, 3, C2, C2)                      # (kh, kw, Cin, Cout)
    h = jax.nn.relu(
        jax.lax.conv_general_dilated(
            h, w2, window_strides=(1, 1), padding="SAME",
            dimension_numbers=("NHWC", "HWIO", "NHWC")) + p["b2"])
    out = jnp.einsum("bhwc,cd->bhwd", h, p["w3"]) + p["b3"] + x
    return jax.nn.relu(out)


# --------------------------------------------------------------------------- params

def init_params(key, N, scale=0.1):
    C2 = N // 2
    ks = jax.random.split(key, 6)
    return {
        "w1": scale * jax.random.normal(ks[0], (N, C2), jnp.float32),
        "b1": scale * jax.random.normal(ks[1], (1, C2), jnp.float32),
        "w2": scale * jax.random.normal(ks[2], (9, C2, C2), jnp.float32),
        "b2": scale * jax.random.normal(ks[3], (1, C2), jnp.float32),
        "w3": scale * jax.random.normal(ks[4], (C2, N), jnp.float32),
        "b3": scale * jax.random.normal(ks[5], (1, N), jnp.float32),
    }


# --------------------------------------------------------------------------- main

if __name__ == "__main__":
    N, B, H, W = 128, 2, 16, 16            # compressai-style N=128, small spatial test
    key = jax.random.PRNGKey(0)
    kx, kp = jax.random.split(key)

    x_nchw = jax.random.normal(kx, (B, N, H, W), jnp.float32)   # PyTorch NCHW input
    x = jnp.transpose(x_nchw, (0, 2, 3, 1))                     # -> NHWC for the kernel
    params = init_params(kp, N)

    ref = residual_unit_ref(x, params)

    # Multi-row-tile path (T=2): exercises interior halos and the zero-padded border rows.
    out_tiled = jax.block_until_ready(
        jax.jit(functools.partial(residual_unit, tile_h=8))(x, params))
    # Auto-picked, generation-aware tile size (whole image per tile at this small size).
    out_auto = jax.block_until_ready(jax.jit(residual_unit)(x, params))

    for out in (out_tiled, out_auto):
        assert out.shape == (B, H, W, N)
        assert bool(jnp.all(jnp.isfinite(out)))
        # bf16 MXU operands with f32 accumulation -> ~1e-2-scale relative error budget.
        assert bool(jnp.allclose(out, ref, atol=5e-2, rtol=5e-2)), \
            float(jnp.max(jnp.abs(out - ref)))
    print("KERNEL_OK")
</pallas_src>

<mosaic_0001>
module attributes {stable_mosaic.version = 11 : i64} {
  func.func @_residual_unit_kernel(%arg0: i32, %arg1: i32, %arg2: memref<1x8x16x128xf32, #tpu.memory_space<vmem>>, %arg3: memref<1x1x2x16x128xf32, #tpu.memory_space<vmem>>, %arg4: memref<128x64xbf16, #tpu.memory_space<vmem>>, %arg5: memref<1x64xf32, #tpu.memory_space<vmem>>, %arg6: memref<576x64xbf16, #tpu.memory_space<vmem>>, %arg7: memref<1x64xf32, #tpu.memory_space<vmem>>, %arg8: memref<64x128xbf16, #tpu.memory_space<vmem>>, %arg9: memref<1x128xf32, #tpu.memory_space<vmem>>, %arg10: memref<1x8x16x128xf32, #tpu.memory_space<vmem>>, %arg11: memref<10x18x64xf32, #tpu.memory_space<vmem>>) attributes {dimension_semantics = [#tpu.dimension_semantics<parallel>, #tpu.dimension_semantics<parallel>], iteration_bounds = array<i64: 2, 2>, scalar_prefetch = 0 : i64, scratch_operands = 1 : i64, tpu.core_type = #tpu.core_type<tc>, window_params = [{transform_indices = @transform_0, window_bounds = array<i64: 1, 8, 16, 128>}, {transform_indices = @transform_1, window_bounds = array<i64: 1, 1, 2, 16, 128>}, {pipeline_mode = #tpu.pipeline_mode<synchronous>, transform_indices = @transform_2, window_bounds = array<i64: 128, 64>}, {pipeline_mode = #tpu.pipeline_mode<synchronous>, transform_indices = @transform_3, window_bounds = array<i64: 1, 64>}, {pipeline_mode = #tpu.pipeline_mode<synchronous>, transform_indices = @transform_4, window_bounds = array<i64: 576, 64>}, {pipeline_mode = #tpu.pipeline_mode<synchronous>, transform_indices = @transform_5, window_bounds = array<i64: 1, 64>}, {pipeline_mode = #tpu.pipeline_mode<synchronous>, transform_indices = @transform_6, window_bounds = array<i64: 64, 128>}, {pipeline_mode = #tpu.pipeline_mode<synchronous>, transform_indices = @transform_7, window_bounds = array<i64: 1, 128>}, {transform_indices = @transform_8, window_bounds = array<i64: 1, 8, 16, 128>}]} {
    %c0 = arith.constant 0 : index
    %c0_0 = arith.constant 0 : index
    %c0_1 = arith.constant 0 : index
    %c0_2 = arith.constant 0 : index
    %0 = vector.load %arg2[%c0, %c0_0, %c0_1, %c0_2] : memref<1x8x16x128xf32, #tpu.memory_space<vmem>>, vector<1x8x16x128xf32>
    %1 = vector.shape_cast %0 : vector<1x8x16x128xf32> to vector<8x16x128xf32>
    %c0_3 = arith.constant 0 : index
    %c0_4 = arith.constant 0 : index
    %c0_5 = arith.constant 0 : index
    %c0_6 = arith.constant 0 : index
    %c0_7 = arith.constant 0 : index
    %2 = vector.load %arg3[%c0_3, %c0_4, %c0_5, %c0_6, %c0_7] : memref<1x1x2x16x128xf32, #tpu.memory_space<vmem>>, vector<1x1x2x16x128xf32>
    %3 = vector.shape_cast %2 : vector<1x1x2x16x128xf32> to vector<2x16x128xf32>
    %4 = vector.extract_strided_slice %3 {offsets = [0, 0, 0], sizes = [1, 16, 128], strides = [1, 1, 1]} : vector<2x16x128xf32> to vector<1x16x128xf32>
    %5 = vector.extract_strided_slice %3 {offsets = [1, 0, 0], sizes = [1, 16, 128], strides = [1, 1, 1]} : vector<2x16x128xf32> to vector<1x16x128xf32>
    %6 = tpu.concatenate %4, %1, %5 in 0 : vector<1x16x128xf32>, vector<8x16x128xf32>, vector<1x16x128xf32> -> vector<10x16x128xf32>
    %7 = vector.shape_cast %6 : vector<10x16x128xf32> to vector<160x128xf32>
    %8 = arith.truncf %7 : vector<160x128xf32> to vector<160x128xbf16>
    %c0_8 = arith.constant 0 : index
    %c0_9 = arith.constant 0 : index
    %9 = vector.load %arg4[%c0_8, %c0_9] : memref<128x64xbf16, #tpu.memory_space<vmem>>, vector<128x64xbf16>
    %cst = arith.constant dense<0.000000e+00> : vector<160x64xf32>
    %10 = tpu.matmul %8, %9, %cst {dimension_numbers = #tpu.dot_dimension_numbers<[1], [0], [0], [1], [0, 0, 1, 1], [], []>} : vector<160x128xbf16>, vector<128x64xbf16>, vector<160x64xf32> -> vector<160x64xf32>
    %c0_10 = arith.constant 0 : index
    %c0_11 = arith.constant 0 : index
    %11 = vector.load %arg5[%c0_10, %c0_11] : memref<1x64xf32, #tpu.memory_space<vmem>>, vector<1x64xf32>
    %12 = vector.broadcast %11 : vector<1x64xf32> to vector<160x64xf32>
    %13 = arith.addf %10, %12 : vector<160x64xf32>
    %cst_12 = arith.constant 0.000000e+00 : f32
    %14 = vector.broadcast %cst_12 : f32 to vector<160x64xf32>
    %15 = arith.maximumf %13, %14 : vector<160x64xf32>
    %16 = vector.shape_cast %15 : vector<160x64xf32> to vector<10x16x64xf32>
    %cst_13 = arith.constant 0.000000e+00 : f32
    %17 = vector.broadcast %cst_13 : f32 to vector<10x1x64xf32>
    %c0_14 = arith.constant 0 : index
    %c0_15 = arith.constant 0 : index
    %c0_16 = arith.constant 0 : index
    %18 = vector.load %arg11[%c0_14, %c0_15, %c0_16] : memref<10x18x64xf32, #tpu.memory_space<vmem>>, vector<10x1x64xf32>
    tpu.vector_store %arg11[%c0_14, %c0_15, %c0_16], %17 {strides = array<i32>} : memref<10x18x64xf32, #tpu.memory_space<vmem>>, vector<10x1x64xf32>,
    %c0_17 = arith.constant 0 : index
    %c17 = arith.constant 17 : index
    %c0_18 = arith.constant 0 : index
    %19 = vector.load %arg11[%c0_17, %c17, %c0_18] : memref<10x18x64xf32, #tpu.memory_space<vmem>>, vector<10x1x64xf32>
    tpu.vector_store %arg11[%c0_17, %c17, %c0_18], %17 {strides = array<i32>} : memref<10x18x64xf32, #tpu.memory_space<vmem>>, vector<10x1x64xf32>,
    %c0_19 = arith.constant 0 : index
    %c1 = arith.constant 1 : index
    %c0_20 = arith.constant 0 : index
    %20 = vector.load %arg11[%c0_19, %c1, %c0_20] : memref<10x18x64xf32, #tpu.memory_space<vmem>>, vector<10x16x64xf32>
    tpu.vector_store %arg11[%c0_19, %c1, %c0_20], %16 {strides = array<i32>} : memref<10x18x64xf32, #tpu.memory_space<vmem>>, vector<10x16x64xf32>,
    %c0_i32 = arith.constant 0 : i32
    %21 = arith.cmpi sgt, %arg1, %c0_i32 : i32
    %22 = arith.extui %21 : i1 to i32
    %23 = arith.sitofp %22 : i32 to f32
    %c1_i32 = arith.constant 1 : i32
    %24 = arith.cmpi slt, %arg1, %c1_i32 : i32
    %25 = arith.extui %24 : i1 to i32
    %26 = arith.sitofp %25 : i32 to f32
    %27 = vector.extract_strided_slice %16 {offsets = [0, 0, 0], sizes = [1, 16, 64], strides = [1, 1, 1]} : vector<10x16x64xf32> to vector<1x16x64xf32>
    %28 = vector.broadcast %23 : f32 to vector<1x16x64xf32>
    %29 = arith.mulf %27, %28 : vector<1x16x64xf32>
    %c0_21 = arith.constant 0 : index
    %c1_22 = arith.constant 1 : index
    %c0_23 = arith.constant 0 : index
    %30 = vector.load %arg11[%c0_21, %c1_22, %c0_23] : memref<10x18x64xf32, #tpu.memory_space<vmem>>, vector<1x16x64xf32>
    tpu.vector_store %arg11[%c0_21, %c1_22, %c0_23], %29 {strides = array<i32>} : memref<10x18x64xf32, #tpu.memory_space<vmem>>, vector<1x16x64xf32>,
    %31 = vector.extract_strided_slice %16 {offsets = [9, 0, 0], sizes = [1, 16, 64], strides = [1, 1, 1]} : vector<10x16x64xf32> to vector<1x16x64xf32>
    %32 = vector.broadcast %26 : f32 to vector<1x16x64xf32>
    %33 = arith.mulf %31, %32 : vector<1x16x64xf32>
    %c9 = arith.constant 9 : index
    %c1_24 = arith.constant 1 : index
    %c0_25 = arith.constant 0 : index
    %34 = vector.load %arg11[%c9, %c1_24, %c0_25] : memref<10x18x64xf32, #tpu.memory_space<vmem>>, vector<1x16x64xf32>
    tpu.vector_store %arg11[%c9, %c1_24, %c0_25], %33 {strides = array<i32>} : memref<10x18x64xf32, #tpu.memory_space<vmem>>, vector<1x16x64xf32>,
    %c0_26 = arith.constant 0 : index
    %c0_27 = arith.constant 0 : index
    %c0_28 = arith.constant 0 : index
    %35 = vector.load %arg11[%c0_26, %c0_27, %c0_28] : memref<10x18x64xf32, #tpu.memory_space<vmem>>, vector<8x16x64xf32>
    %36 = vector.shape_cast %35 : vector<8x16x64xf32> to vector<128x64xf32>
    %c0_29 = arith.constant 0 : index
    %c1_30 = arith.constant 1 : index
    %c0_31 = arith.constant 0 : index
    %37 = vector.load %arg11[%c0_29, %c1_30, %c0_31] : memref<10x18x64xf32, #tpu.memory_space<vmem>>, vector<8x16x64xf32>
    %38 = vector.shape_cast %37 : vector<8x16x64xf32> to vector<128x64xf32>
    %c0_32 = arith.constant 0 : index
    %c2 = arith.constant 2 : index
    %c0_33 = arith.constant 0 : index
    %39 = vector.load %arg11[%c0_32, %c2, %c0_33] : memref<10x18x64xf32, #tpu.memory_space<vmem>>, vector<8x16x64xf32>
    %40 = vector.shape_cast %39 : vector<8x16x64xf32> to vector<128x64xf32>
    %c1_34 = arith.constant 1 : index
    %c0_35 = arith.constant 0 : index
    %c0_36 = arith.constant 0 : index
    %41 = vector.load %arg11[%c1_34, %c0_35, %c0_36] : memref<10x18x64xf32, #tpu.memory_space<vmem>>, vector<8x16x64xf32>
    %42 = vector.shape_cast %41 : vector<8x16x64xf32> to vector<128x64xf32>
    %c1_37 = arith.constant 1 : index
    %c1_38 = arith.constant 1 : index
    %c0_39 = arith.constant 0 : index
    %43 = vector.load %arg11[%c1_37, %c1_38, %c0_39] : memref<10x18x64xf32, #tpu.memory_space<vmem>>, vector<8x16x64xf32>
    %44 = vector.shape_cast %43 : vector<8x16x64xf32> to vector<128x64xf32>
    %c1_40 = arith.constant 1 : index
    %c2_41 = arith.constant 2 : index
    %c0_42 = arith.constant 0 : index
    %45 = vector.load %arg11[%c1_40, %c2_41, %c0_42] : memref<10x18x64xf32, #tpu.memory_space<vmem>>, vector<8x16x64xf32>
    %46 = vector.shape_cast %45 : vector<8x16x64xf32> to vector<128x64xf32>
    %c2_43 = arith.constant 2 : index
    %c0_44 = arith.constant 0 : index
    %c0_45 = arith.constant 0 : index
    %47 = vector.load %arg11[%c2_43, %c0_44, %c0_45] : memref<10x18x64xf32, #tpu.memory_space<vmem>>, vector<8x16x64xf32>
    %48 = vector.shape_cast %47 : vector<8x16x64xf32> to vector<128x64xf32>
    %c2_46 = arith.constant 2 : index
    %c1_47 = arith.constant 1 : index
    %c0_48 = arith.constant 0 : index
    %49 = vector.load %arg11[%c2_46, %c1_47, %c0_48] : memref<10x18x64xf32, #tpu.memory_space<vmem>>, vector<8x16x64xf32>
    %50 = vector.shape_cast %49 : vector<8x16x64xf32> to vector<128x64xf32>
    %c2_49 = arith.constant 2 : index
    %c2_50 = arith.constant 2 : index
    %c0_51 = arith.constant 0 : index
    %51 = vector.load %arg11[%c2_49, %c2_50, %c0_51] : memref<10x18x64xf32, #tpu.memory_space<vmem>>, vector<8x16x64xf32>
    %52 = vector.shape_cast %51 : vector<8x16x64xf32> to vector<128x64xf32>
    %53 = tpu.concatenate %36, %38, %40, %42, %44, %46, %48, %50, %52 in 1 : vector<128x64xf32>, vector<128x64xf32>, vector<128x64xf32>, vector<128x64xf32>, vector<128x64xf32>, vector<128x64xf32>, vector<128x64xf32>, vector<128x64xf32>, vector<128x64xf32> -> vector<128x576xf32>
    %54 = arith.truncf %53 : vector<128x576xf32> to vector<128x576xbf16>
    %c0_52 = arith.constant 0 : index
    %c0_53 = arith.constant 0 : index
    %55 = vector.load %arg6[%c0_52, %c0_53] : memref<576x64xbf16, #tpu.memory_space<vmem>>, vector<576x64xbf16>
    %cst_54 = arith.constant dense<0.000000e+00> : vector<128x64xf32>
    %56 = tpu.matmul %54, %55, %cst_54 {dimension_numbers = #tpu.dot_dimension_numbers<[1], [0], [0], [1], [0, 0, 1, 1], [], []>} : vector<128x576xbf16>, vector<576x64xbf16>, vector<128x64xf32> -> vector<128x64xf32>
    %c0_55 = arith.constant 0 : index
    %c0_56 = arith.constant 0 : index
    %57 = vector.load %arg7[%c0_55, %c0_56] : memref<1x64xf32, #tpu.memory_space<vmem>>, vector<1x64xf32>
    %58 = vector.broadcast %57 : vector<1x64xf32> to vector<128x64xf32>
    %59 = arith.addf %56, %58 : vector<128x64xf32>
    %cst_57 = arith.constant 0.000000e+00 : f32
    %60 = vector.broadcast %cst_57 : f32 to vector<128x64xf32>
    %61 = arith.maximumf %59, %60 : vector<128x64xf32>
    %62 = arith.truncf %61 : vector<128x64xf32> to vector<128x64xbf16>
    %c0_58 = arith.constant 0 : index
    %c0_59 = arith.constant 0 : index
    %63 = vector.load %arg8[%c0_58, %c0_59] : memref<64x128xbf16, #tpu.memory_space<vmem>>, vector<64x128xbf16>
    %cst_60 = arith.constant dense<0.000000e+00> : vector<128x128xf32>
    %64 = tpu.matmul %62, %63, %cst_60 {dimension_numbers = #tpu.dot_dimension_numbers<[1], [0], [0], [1], [0, 0, 1, 1], [], []>} : vector<128x64xbf16>, vector<64x128xbf16>, vector<128x128xf32> -> vector<128x128xf32>
    %c0_61 = arith.constant 0 : index
    %c0_62 = arith.constant 0 : index
    %65 = vector.load %arg9[%c0_61, %c0_62] : memref<1x128xf32, #tpu.memory_space<vmem>>, vector<1x128xf32>
    %66 = vector.broadcast %65 : vector<1x128xf32> to vector<128x128xf32>
    %67 = arith.addf %64, %66 : vector<128x128xf32>
    %68 = vector.shape_cast %1 : vector<8x16x128xf32> to vector<128x128xf32>
    %69 = arith.addf %67, %68 : vector<128x128xf32>
    %cst_63 = arith.constant 0.000000e+00 : f32
    %70 = vector.broadcast %cst_63 : f32 to vector<128x128xf32>
    %71 = arith.maximumf %69, %70 : vector<128x128xf32>
    %72 = vector.shape_cast %71 : vector<128x128xf32> to vector<8x16x128xf32>
    %c0_64 = arith.constant 0 : index
    %c0_65 = arith.constant 0 : index
    %c0_66 = arith.constant 0 : index
    %c0_67 = arith.constant 0 : index
    %73 = vector.load %arg10[%c0_64, %c0_65, %c0_66, %c0_67] : memref<1x8x16x128xf32, #tpu.memory_space<vmem>>, vector<1x8x16x128xf32>
    %74 = vector.shape_cast %73 : vector<1x8x16x128xf32> to vector<8x16x128xf32>
    %75 = vector.shape_cast %72 : vector<8x16x128xf32> to vector<1x8x16x128xf32>
    tpu.vector_store %arg10[%c0_64, %c0_65, %c0_66, %c0_67], %75 {strides = array<i32>} : memref<1x8x16x128xf32, #tpu.memory_space<vmem>>, vector<1x8x16x128xf32>,
    return
  }
  func.func @transform_0(%arg0: i32, %arg1: i32) -> (i32, i32, i32, i32) {
    %c0_i32 = arith.constant 0 : i32
    %c0_i32_0 = arith.constant 0 : i32
    %c0_i32_1 = arith.constant 0 : i32
    return %arg0, %arg1, %c0_i32, %c0_i32_0 : i32, i32, i32, i32
  }
  func.func @transform_1(%arg0: i32, %arg1: i32) -> (i32, i32, i32, i32, i32) {
    %c0_i32 = arith.constant 0 : i32
    %c0_i32_0 = arith.constant 0 : i32
    %c0_i32_1 = arith.constant 0 : i32
    %c0_i32_2 = arith.constant 0 : i32
    return %arg0, %arg1, %c0_i32, %c0_i32_0, %c0_i32_1 : i32, i32, i32, i32, i32
  }
  func.func @transform_2(%arg0: i32, %arg1: i32) -> (i32, i32) {
    %c0_i32 = arith.constant 0 : i32
    %c0_i32_0 = arith.constant 0 : i32
    %c0_i32_1 = arith.constant 0 : i32
    return %c0_i32, %c0_i32_0 : i32, i32
  }
  func.func @transform_3(%arg0: i32, %arg1: i32) -> (i32, i32) {
    %c0_i32 = arith.constant 0 : i32
    %c0_i32_0 = arith.constant 0 : i32
    %c0_i32_1 = arith.constant 0 : i32
    return %c0_i32, %c0_i32_0 : i32, i32
  }
  func.func @transform_4(%arg0: i32, %arg1: i32) -> (i32, i32) {
    %c0_i32 = arith.constant 0 : i32
    %c0_i32_0 = arith.constant 0 : i32
    %c0_i32_1 = arith.constant 0 : i32
    return %c0_i32, %c0_i32_0 : i32, i32
  }
  func.func @transform_5(%arg0: i32, %arg1: i32) -> (i32, i32) {
    %c0_i32 = arith.constant 0 : i32
    %c0_i32_0 = arith.constant 0 : i32
    %c0_i32_1 = arith.constant 0 : i32
    return %c0_i32, %c0_i32_0 : i32, i32
  }
  func.func @transform_6(%arg0: i32, %arg1: i32) -> (i32, i32) {
    %c0_i32 = arith.constant 0 : i32
    %c0_i32_0 = arith.constant 0 : i32
    %c0_i32_1 = arith.constant 0 : i32
    return %c0_i32, %c0_i32_0 : i32, i32
  }
  func.func @transform_7(%arg0: i32, %arg1: i32) -> (i32, i32) {
    %c0_i32 = arith.constant 0 : i32
    %c0_i32_0 = arith.constant 0 : i32
    %c0_i32_1 = arith.constant 0 : i32
    return %c0_i32, %c0_i32_0 : i32, i32
  }
  func.func @transform_8(%arg0: i32, %arg1: i32) -> (i32, i32, i32, i32) {
    %c0_i32 = arith.constant 0 : i32
    %c0_i32_0 = arith.constant 0 : i32
    %c0_i32_1 = arith.constant 0 : i32
    return %arg0, %arg1, %c0_i32, %c0_i32_0 : i32, i32, i32, i32
  }
}

</mosaic_0001>

<bundles_post_ra>
// kernel: residual_unit.1
= control target key start
LH: loop header
LB: loop body
LE: loop exit
PB: predicated region body
PF: predicated region fallthrough
CT: control target
= control target key end

     0   :  { %s4442_s0 = inlined_call_operand.hbm [shape: f32[2,16,16,128], index: 0, kind: input, shape index: {}]   ;;  %s4443_s1 = inlined_call_operand.hbm [shape: f32[2,2,2,16,128], index: 1, kind: input, shape index: {}]   ;;  %s4444_s2 = inlined_call_operand.hbm [shape: bf16[128,64], index: 2, kind: input, shape index: {}]   ;;  %s4445_s3 = inlined_call_operand.hbm [shape: f32[1,64], index: 3, kind: input, shape index: {}]   ;;  %s4446_s4 = inlined_call_operand.hbm [shape: bf16[576,64], index: 4, kind: input, shape index: {}]   ;;  %s4447_s5 = inlined_call_operand.hbm [shape: f32[1,64], index: 5, kind: input, shape index: {}]   ;;  %s4448_s6 = inlined_call_operand.hbm [shape: bf16[64,128], index: 6, kind: input, shape index: {}]   ;;  %s4449_s7 = inlined_call_operand.hbm [shape: f32[1,128], index: 7, kind: input, shape index: {}]   ;;  %s4450_s8 = inlined_call_operand.hbm [shape: f32[2,16,16,128], index: 8, kind: output, shape index: {}]  }
   0x1   :  { %4468 = sst [smem:[#allocation35_spill]] %s4442_s0 }
   0x2   :  { %4469 = sst [smem:[#allocation36_spill]] %s4444_s2 }
   0x3   :  { %4470 = sst [smem:[#allocation37_spill]] %s4445_s3 }
   0x4   :  { %4471 = sst [smem:[#allocation38_spill]] %s4446_s4 }
   0x5   :  { %4472 = sst [smem:[#allocation39_spill]] %s4447_s5 }
   0x6   :  { %4473 = sst [smem:[#allocation40_spill]] %s4448_s6 }
   0x7   :  { %4474 = sst [smem:[#allocation41_spill]] %s4449_s7 }
   0x8   :  { %4475 = sst [smem:[#allocation42_spill]] %s4450_s8 }
   0x9   :  { %13 = vsyncpa [#allocation4], 0 }
   0xa   :  { %15 = vsyncpa [#allocation4 + $0x1], 0 }
   0xb   :  { %16 = vsyncpa [#allocation7], 0 }
   0xc   :  { %18 = vsyncpa [#allocation7 + $0x1], 0 }
   0xd   :  { %19 = vsyncpa [#allocation10], 0 }
   0xe   :  { %20 = vsyncpa [#allocation13], 0 }
   0xf   :  { %21 = vsyncpa [#allocation16], 0 }
  0x10   :  { %22 = vsyncpa [#allocation5], 0 }
  0x11   :  { %24 = vsyncpa [#allocation5 + $0x1], 0  ;;  %s3455_s27 = smov 0   ;;  %s3457_s28 = smov 0  }
  0x12   :  { %s3459_s29 = smov 0   ;;  %s3461_s30 = smov 0  }
  0x13   :  { %s3463_s9 = smov 0   ;;  %s3465_s10 = smov 0  }
  0x14   :  { %s3467_s11 = smov 0   ;;  %s3469_s12 = smov 0  }
  0x15 LB: > { %4476 = sst [smem:[#allocation25_spill]] %s3375_s30  ;;  %s3496_s13 = sadd.s32 4294967295, %s3391_s12   ;;  %s3391_s12 = sphi %s3469_s12, %s30_s12   ;;  %s3387_s11 = sphi %s3467_s11, %s4534_s11   ;;  %s3383_s10 = sphi %s3465_s10, %s4533_s10   ;;  %s3379_s9 = sphi %s3463_s9, %s4532_s9   ;;  %s3375_s30 = sphi %s3461_s30, %s4531_s30   ;;  %s3371_s29 = sphi %s3459_s29, %s4530_s29   ;;  %s3367_s28 = sphi %s3457_s28, %s4529_s28   ;;  %s3363_s27 = sphi %s3455_s27, %s4528_s27  }
  0x16   : > { %4477 = sst [smem:[#allocation26_spill]] %s3379_s9  ;;  %p2304_p0 = scmp.ge.s32.totalorder %s3391_s12, 1 }
  0x17   : > { %p4454_p1 = scmp.eq.s32.totalorder %s3496_s13, 0  ;;  %p257_p2 = scmp.lt.s32.totalorder %s3391_s12, 5 }
  0x18   : > { %s3393_s15 = smov [#allocation8]   ;;  %s3394_s18 = smov [#allocation9]  }
  0x19   : > { %p3501_p3 = pnand %p2304_p0, %p257_p2  ;;  %s269_s16 = sshll.u32 %s3393_s15, 4  ;;  %s3505_s16 = int_to_ptr.vmem [resolvable:$true] %s269_s16 }
  0x1a   : > { %s283_s19 = sshll.u32 %s3394_s18, 4  ;;  %s3395_s20 = smov [#allocation12]   ;;  %s3515_s19 = int_to_ptr.vmem [resolvable:$true] %s283_s19 }
  0x1b   : > { %s4478_s14 = scalar_select %p3501_p3, 1, 0 }
  0x1c   : > { %p2699_p4 = pneg %p3501_p3  ;;  %s3517_s21 = sshll.u32 %s3395_s20, 4  ;;  %s308_s21 = int_to_ptr.vmem [resolvable:$true] %s3517_s21 }
  0x1d   : > { %4479 = sst [smem:[#allocation27_spill]] %s4478_s14  ;;  %s4481_s2 = sld [smem:[#allocation36_spill]] }
  0x1e   : > { %p3511_p5 = pnand %p2699_p4, %p4454_p1 }
  0x20   : > { %p3527_p7 = pneg %p3511_p5 }
  0x23   : > { %s3045_s24 = scalar_lea.hbm %s4481_s2, 1024 }
  0x24   : > { %p3046_p6 = scmp.ne.s32.totalorder %s4481_s2, %s3045_s24  ;;  %p3052_p10 = scmp.lt.u32.totalorder %s3045_s24, %s4481_s2 }
  0x26   : > { %p3048_p8 = pnand %p3527_p7, %p3046_p6 }
  0x28   : > { %p3049_p9 = pneg %p3048_p8 }
  0x2a   : > { %p3054_p11 = pnand %p3052_p10, %p3049_p9 }
  0x2c   : > { %3057 = shalt.err (!%p3054_p11)
}
  0x2d   : > { %s3058_s22 = scalar_lea.vmem %s3505_s16, 1024  ;;  %p3066_p2 = scmp.lt.s32.totalorder %s3505_s16, %s3505_s16 }
  0x2e   : > { %p3059_p12 = scmp.ne.s32.totalorder %s3505_s16, %s3058_s22  ;;  %p3067_p4 = scmp.lt.s32.totalorder %s3058_s22, %s3058_s22 }
  0x30   : > { %p3061_p13 = pnand %p3059_p12, %p3527_p7  ;;  %p3068_p6 = por %p3067_p4, %p3066_p2 }
  0x32   : > { %p3062_p0 = pneg %p3061_p13 }
  0x34   : > { %p3069_p8 = pnand %p3068_p6, %p3062_p0 }
  0x36   : > { %3072 = shalt.err (!%p3069_p8)
}
  0x37   : > { %s4456_s23 = smov 64   ;;  %s3397_s24 = smov 4  }
  0x38   : > { %2702 = dma.hbm_to_vmem [thread:$0]  (!%p3511_p5), %s4481_s2, 1024, %s3505_s16, [#allocation7], %s4456_s23, %s4456_s23, %s3397_s24  }
  0x39   : > { %s4483_s3 = sld [smem:[#allocation37_spill]] }
  0x3f   : > { %s3073_s22 = scalar_lea.hbm %s4483_s3, 16 }
  0x40   : > { %p3074_p9 = scmp.ne.s32.totalorder %s4483_s3, %s3073_s22  ;;  %p3080_p12 = scmp.lt.u32.totalorder %s3073_s22, %s4483_s3 }
  0x42   : > { %p3076_p10 = pnand %p3074_p9, %p3527_p7 }
  0x44   : > { %p3077_p11 = pneg %p3076_p10 }
  0x46   : > { %p3082_p13 = pnand %p3080_p12, %p3077_p11 }
  0x48   : > { %3085 = shalt.err (!%p3082_p13)
}
  0x49   : > { %s3086_s16 = scalar_lea.vmem %s3515_s19, 16  ;;  %s3093_s8 = scalar_lea.vmem %s3515_s19, 32 }
  0x4a   : > { %p3087_p0 = scmp.ne.s32.totalorder %s3515_s19, %s3086_s16  ;;  %p3094_p6 = scmp.lt.s32.totalorder %s3515_s19, %s3515_s19 }
  0x4b   : > { %p3095_p8 = scmp.lt.s32.totalorder %s3093_s8, %s3086_s16 }
  0x4c   : > { %p3089_p2 = pnand %p3087_p0, %p3527_p7 }
  0x4d   : > { %p3096_p9 = por %p3095_p8, %p3094_p6 }
  0x4e   : > { %p3090_p4 = pneg %p3089_p2 }
  0x50   : > { %p3097_p10 = pnand %p3096_p9, %p3090_p4 }
  0x52   : > { %3100 = shalt.err (!%p3097_p10)
}
  0x53   : > { %2705 = dma.hbm_to_vmem [thread:$0]  (!%p3511_p5), %s4483_s3, 16, %s3515_s19, [#allocation10]  }
  0x54   : > { %s4484_s5 = sld [smem:[#allocation39_spill]] }
  0x5a   : > { %s3101_s26 = scalar_lea.hbm %s4484_s5, 16 }
  0x5b   : > { %p3102_p11 = scmp.ne.s32.totalorder %s4484_s5, %s3101_s26  ;;  %p3108_p0 = scmp.lt.u32.totalorder %s3101_s26, %s4484_s5 }
  0x5d   : > { %p3104_p12 = pnand %p3102_p11, %p3527_p7 }
  0x5f   : > { %p3105_p13 = pneg %p3104_p12 }
  0x61   : > { %p3110_p2 = pnand %p3108_p0, %p3105_p13 }
  0x63   : > { %3113 = shalt.err (!%p3110_p2)
}
  0x64   : > { %s3114_s8 = scalar_lea.vmem %s308_s21, 16  ;;  %s3121_s19 = scalar_lea.vmem %s308_s21, 32 }
  0x65   : > { %p3115_p4 = scmp.ne.s32.totalorder %s308_s21, %s3114_s8  ;;  %p3122_p9 = scmp.lt.s32.totalorder %s308_s21, %s308_s21 }
  0x66   : > { %p3123_p10 = scmp.lt.s32.totalorder %s3121_s19, %s3114_s8 }
  0x67   : > { %p3117_p6 = pnand %p3115_p4, %p3527_p7 }
  0x68   : > { %p3124_p1 = por %p3123_p10, %p3122_p9 }
  0x69   : > { %p3118_p8 = pneg %p3117_p6 }
  0x6b   : > { %p3125_p3 = pnand %p3124_p1, %p3118_p8 }
  0x6d   : > { %3128 = shalt.err (!%p3125_p3)
}
  0x6e   : > { %2711 = dma.hbm_to_vmem [thread:$0]  (!%p3511_p5), %s4484_s5, 16, %s308_s21, [#allocation13]  }
  0x6f   : > { %s3398_s14 = smov [#allocation11]   ;;  %s3399_s26 = smov [#allocation14]  }
  0x70   : > { %s293_s25 = sshll.u32 %s3398_s14, 4  ;;  %s317_s18 = sshll.u32 %s3399_s26, 4  ;;  %s294_s25 = int_to_ptr.vmem [resolvable:$true] %s293_s25  ;;  %s318_s18 = int_to_ptr.vmem [resolvable:$true] %s317_s18 }
  0x71   : > { %s4485_s4 = sld [smem:[#allocation38_spill]] }
  0x77   : > { %s3129_s16 = scalar_lea.hbm %s4485_s4, 4608 }
  0x78   : > { %p3130_p1 = scmp.ne.s32.totalorder %s4485_s4, %s3129_s16  ;;  %p3136_p12 = scmp.lt.u32.totalorder %s3129_s16, %s4485_s4 }
  0x7a   : > { %p3132_p3 = pnand %p3130_p1, %p3527_p7 }
  0x7c   : > { %p3133_p11 = pneg %p3132_p3 }
  0x7e   : > { %p3138_p13 = pnand %p3136_p12, %p3133_p11 }
  0x80   : > { %3141 = shalt.err (!%p3138_p13)
}
  0x81   : > { %s3142_s21 = scalar_lea.vmem %s294_s25, 4608  ;;  %p3150_p6 = scmp.lt.s32.totalorder %s294_s25, %s294_s25 }
  0x82   : > { %p3143_p0 = scmp.ne.s32.totalorder %s294_s25, %s3142_s21  ;;  %p3151_p8 = scmp.lt.s32.totalorder %s3142_s21, %s3142_s21 }
  0x84   : > { %p3145_p2 = pnand %p3143_p0, %p3527_p7  ;;  %p3152_p9 = por %p3151_p8, %p3150_p6 }
  0x86   : > { %p3146_p4 = pneg %p3145_p2 }
  0x88   : > { %p3153_p10 = pnand %p3152_p9, %p3146_p4 }
  0x8a   : > { %3156 = shalt.err (!%p3153_p10)
}
  0x8b   : > { %s4486_s9 = smov 64   ;;  %s4487_s6 = sld [smem:[#allocation40_spill]] }
  0x8c   : > { %2708 = dma.hbm_to_vmem [thread:$0]  (!%p3511_p5), %s4485_s4, 4608, %s294_s25, [#allocation10], %s4486_s9, %s4486_s9, %s3397_s24  }
  0x91   : > { %s3157_s22 = scalar_lea.hbm %s4487_s6, 512 }
  0x92   : > { %p3158_p1 = scmp.ne.s32.totalorder %s4487_s6, %s3157_s22  ;;  %p3164_p12 = scmp.lt.u32.totalorder %s3157_s22, %s4487_s6 }
  0x94   : > { %p3160_p3 = pnand %p3158_p1, %p3527_p7 }
  0x96   : > { %p3161_p11 = pneg %p3160_p3 }
  0x98   : > { %p3166_p13 = pnand %p3164_p12, %p3161_p11 }
  0x9a   : > { %3169 = shalt.err (!%p3166_p13)
}
  0x9b   : > { %s3170_s21 = scalar_lea.vmem %s318_s18, 512  ;;  %p3178_p6 = scmp.lt.s32.totalorder %s318_s18, %s318_s18 }
  0x9c   : > { %p3171_p0 = scmp.ne.s32.totalorder %s318_s18, %s3170_s21  ;;  %p3179_p8 = scmp.lt.s32.totalorder %s3170_s21, %s3170_s21 }
  0x9e   : > { %p3173_p2 = pnand %p3171_p0, %p3527_p7  ;;  %p3180_p9 = por %p3179_p8, %p3178_p6 }
  0xa0   : > { %p3174_p4 = pneg %p3173_p2 }
  0xa2   : > { %p3181_p10 = pnand %p3180_p9, %p3174_p4 }
  0xa4   : > { %3184 = shalt.err (!%p3181_p10)
}
  0xa5   : > { %2714 = dma.hbm_to_vmem [thread:$0]  (!%p3511_p5), %s4487_s6, 512, %s318_s18, [#allocation13], %s4486_s9, %s4486_s9, %s3397_s24  }
  0xa6   : > { %s3400_s14 = smov [#allocation15]   ;;  %s4488_s7 = sld [smem:[#allocation41_spill]] }
  0xa7   : > { %s331_s26 = sshll.u32 %s3400_s14, 4  ;;  %s332_s26 = int_to_ptr.vmem [resolvable:$true] %s331_s26 }
  0xac   : > { %s3185_s16 = scalar_lea.hbm %s4488_s7, 16 }
  0xad   : > { %p3186_p1 = scmp.ne.s32.totalorder %s4488_s7, %s3185_s16  ;;  %p3192_p12 = scmp.lt.u32.totalorder %s3185_s16, %s4488_s7 }
  0xaf   : > { %p3188_p3 = pnand %p3186_p1, %p3527_p7 }
  0xb1   : > { %p3189_p11 = pneg %p3188_p3 }
  0xb3   : > { %p3194_p13 = pnand %p3192_p12, %p3189_p11 }
  0xb5   : > { %3197 = shalt.err (!%p3194_p13)
}
  0xb6   : > { %s3198_s24 = scalar_lea.vmem %s332_s26, 16  ;;  %s3205_s18 = scalar_lea.vmem %s332_s26, 32 }
  0xb7   : > { %p3199_p0 = scmp.ne.s32.totalorder %s332_s26, %s3198_s24  ;;  %p3206_p6 = scmp.lt.s32.totalorder %s332_s26, %s332_s26 }
  0xb8   : > { %p3207_p8 = scmp.lt.s32.totalorder %s3205_s18, %s3198_s24 }
  0xb9   : > { %p3201_p2 = pnand %p3199_p0, %p3527_p7 }
  0xba   : > { %p3208_p9 = por %p3207_p8, %p3206_p6 }
  0xbb   : > { %p3202_p4 = pneg %p3201_p2 }
  0xbd   : > { %p3209_p10 = pnand %p3208_p9, %p3202_p4 }
  0xbf   : > { %3212 = shalt.err (!%p3209_p10)
}
  0xc0   : > { %2717 = dma.hbm_to_vmem [thread:$0]  (!%p3511_p5), %s4488_s7, 16, %s332_s26, [#allocation16]  }
  0xc1   : > { %s2303_s15 = sadd.s32 4294967294, %s3391_s12   ;;  %s39_s23 = sadd.s32 1, %s3383_s10 }
  0xc2   : > { %p40_p7 = scmp.ge.s32.totalorder %s39_s23, 2  ;;  %s42_s17 = sadd.s32 1, %s3387_s11 }
  0xc3   : > { %s51_s14 = sadd.s32 1, %s3371_s29  ;;  %p58_p1 = scmp.ne.s32.totalorder %s3371_s29, %s3367_s28 }
  0xc4   : > { %s4536_s23 = smov (%p40_p7, %s39_s23), 0  ;;  %s4538_s17 = smov (!%p40_p7, %s42_s17), %s3387_s11 }
  0xc5   : > { %s47_s20 = ssub.s32 %s3383_s10, %s4536_s23  ;;  %p59_p3 = scmp.eq.s32.totalorder %s3391_s12, 0 }
  0xc6   : > { %p44_p11 = scmp.ge.s32.totalorder %s4538_s17, 2  ;;  %p64_p5 = scmp.ne.s32.totalorder %s3367_s28, %s3363_s27 }
  0xc7   : > { %p3668_p12 = por %p59_p3, %p58_p1  ;;  %p244_p13 = scmp.eq.s32.totalorder %s3496_s13, 3 }
  0xc8   : > { %s4540_s17 = smov (%p44_p11, %s4538_s17), 0  ;;  %p4491_p0 = scmp.eq.s32.totalorder %s3496_s13, 0 }
  0xc9   : > { %4490 = sst [smem:[#allocation28_spill]] %s4540_s17  ;;  %p3681_p4 = por %p244_p13, %p58_p1 }
  0xca   : > { %p3677_p2 = por %p4491_p0, %p64_p5  ;;  %s46_s8 = ssub.s32 %s3387_s11, %s4540_s17 }
  0xcb   : > { %s4493_s16 = scalar_select %p3681_p4, 1, 0 }
  0xcc   : > { %p250_p6 = scmp.eq.s32.totalorder %s2303_s15, 3  ;;  %s48_s19 = sor.u32 %s47_s20, %s46_s8 }
  0xcd   : > { %p2735_p8 = scmp.lt.s32.totalorder %s3391_s12, 4  ;;  %p49_p9 = scmp.eq.s32.totalorder %s48_s19, 0 }
  0xce   : > { %p3688_p10 = por %p250_p6, %p64_p5  ;;  %s3693_s21 = sand.u32 1, %s3371_s29  }
  0xcf   : > { %s2405_s24 = sshll.u32 %s3383_s10, 4  ;;  %s2312_s9 = sshll.u32 %s3693_s21, 7 }
  0xd0   : > { %s4494_s30 = scalar_select %p3688_p10, 1, 0 }
  0xd1   : > { %s3697_s18 = scalar_select %p49_p9, %s3371_s29, %s51_s14  }
  0xd2   : > { %s2315_s25 = sshll.u32 %s3387_s11, 5  ;;  %s346_s2 = scalar_lea.vmem [#allocation3], %s2312_s9 }
  0xd3   : > { %s353_s15 = sadd.s32 %s2405_s24, %s2315_s25  ;;  %s356_s3 = sshll.u32 %s346_s2, 4  ;;  %s3701_s3 = int_to_ptr.vmem [resolvable:$true] %s356_s3 }
  0xd4   : > { %s2316_s20 = sshll.u32 %s353_s15, 7  ;;  %s4495_s0 = sld [smem:[#allocation35_spill]] }
  0xd5   : > { %p3712_p7 = pnand %p2735_p8, %p3668_p12  ;;  %s343_s24 = scalar_lea.sflag [#allocation4], %s3693_s21 }
  0xd7   : > { %p3215_p3 = pneg %p3712_p7 }
  0xda   : > { %s3706_s4 = scalar_lea.hbm %s4495_s0, %s2316_s20  ;;  %s3218_s15 = scalar_lea.hbm %s4495_s0, 8192 }
  0xdb   : > { %s3213_s9 = scalar_lea.hbm %s3706_s4, 2048  ;;  %p3219_p12 = scmp.lt.u32.totalorder %s3706_s4, %s4495_s0 }
  0xdc   : > { %p3214_p1 = scmp.ne.s32.totalorder %s3706_s4, %s3213_s9  ;;  %p3220_p13 = scmp.lt.u32.totalorder %s3218_s15, %s3213_s9 }
  0xdd   : > { %p3222_p6 = scmp.lt.u32.totalorder %s3213_s9, %s3706_s4 }
  0xde   : > { %p3216_p11 = pnand %p3215_p3, %p3214_p1  ;;  %p3221_p0 = por %p3220_p13, %p3219_p12 }
  0xe0   : > { %p3217_p5 = pneg %p3216_p11  ;;  %p3223_p8 = por %p3222_p6, %p3221_p0 }
  0xe2   : > { %p3224_p9 = pnand %p3223_p8, %p3217_p5 }
  0xe4   : > { %3227 = shalt.err (!%p3224_p9)
}
  0xe5   : > { %s3228_s19 = scalar_lea.vmem %s3701_s3, 2048  ;;  %s3401_s26 = smov [#allocation3]  }
  0xe6   : > { %p3229_p1 = scmp.ne.s32.totalorder %s3701_s3, %s3228_s19  ;;  %s3233_s25 = sshll.u32 %s3401_s26, 4  ;;  %s3234_s25 = int_to_ptr.vmem [resolvable:$false] %s3233_s25 }
  0xe7   : > { %s3235_s20 = scalar_lea.vmem %s3234_s25, 4096  ;;  %p3236_p4 = scmp.lt.s32.totalorder %s3701_s3, %s3234_s25 }
  0xe8   : > { %p3231_p11 = pnand %p3229_p1, %p3215_p3  ;;  %p3237_p12 = scmp.lt.s32.totalorder %s3235_s20, %s3228_s19 }
  0xea   : > { %p3232_p10 = pneg %p3231_p11  ;;  %p3238_p13 = por %p3237_p12, %p3236_p4 }
  0xec   : > { %p3239_p0 = pnand %p3238_p13, %p3232_p10 }
  0xee   : > { %3242 = shalt.err (!%p3239_p0)
}
  0xef   : > { %s3402_s9 = smov 128   ;;  %s3403_s15 = smov 8  }
  0xf0   : > { %2721 = dma.hbm_to_vmem [thread:$0]  (!%p3712_p7), %s3706_s4, 2048, %s3701_s3, %s343_s24, %s3402_s9, %s3402_s9, %s3403_s15  }
  0xf1   : > { %s2317_s8 = sshll.u32 %s3693_s21, 5  ;;  %s2318_s19 = sshll.u32 %s3383_s10, 2 }
  0xf2   : > { %s2319_s26 = sshll.u32 %s3387_s11, 3  ;;  %s370_s25 = scalar_lea.vmem [#allocation6], %s2317_s8 }
  0xf3   : > { %s379_s20 = sshll.u32 %s370_s25, 4  ;;  %s376_s2 = sadd.s32 %s2319_s26, %s2318_s19  ;;  %s3751_s20 = int_to_ptr.vmem [resolvable:$true] %s379_s20 }
  0xf4   : > { %s2320_s0 = sshll.u32 %s376_s2, 7  ;;  %s4497_s17 = sand.u32 1, %s3391_s12  }
  0xf5   : > { %s3756_s7 = scalar_lea.hbm %s4443_s1, %s2320_s0  ;;  %s3760_s3 = scalar_lea.sflag [#allocation7], %s4497_s17 }
  0xf6   : > { %s3243_s4 = scalar_lea.hbm %s3756_s7, 512  ;;  %s3248_s24 = scalar_lea.hbm %s4443_s1, 2048 }
  0xf7   : > { %p3244_p4 = scmp.ne.s32.totalorder %s3756_s7, %s3243_s4  ;;  %p3249_p6 = scmp.lt.u32.totalorder %s3756_s7, %s4443_s1 }
  0xf8   : > { %p3250_p8 = scmp.lt.u32.totalorder %s3248_s24, %s3243_s4  ;;  %p3252_p1 = scmp.lt.u32.totalorder %s3243_s4, %s3756_s7 }
  0xf9   : > { %p3246_p10 = pnand %p3244_p4, %p3215_p3 }
  0xfa   : > { %p3251_p9 = por %p3250_p8, %p3249_p6 }
  0xfb   : > { %p3247_p5 = pneg %p3246_p10 }
  0xfc   : > { %p3253_p11 = por %p3252_p1, %p3251_p9 }
  0xfe   : > { %p3254_p12 = pnand %p3253_p11, %p3247_p5 }
 0x100   : > { %3257 = shalt.err (!%p3254_p12)
}
 0x101   : > { %s3258_s6 = scalar_lea.vmem %s3751_s20, 512  ;;  %s3404_s17 = smov [#allocation6]  }
 0x102   : > { %p3259_p13 = scmp.ne.s32.totalorder %s3751_s20, %s3258_s6  ;;  %s3263_s8 = sshll.u32 %s3404_s17, 4  ;;  %s3264_s8 = int_to_ptr.vmem [resolvable:$false] %s3263_s8 }
 0x103   : > { %s3265_s19 = scalar_lea.vmem %s3264_s8, 1024  ;;  %p3266_p10 = scmp.lt.s32.totalorder %s3751_s20, %s3264_s8 }
 0x104   : > { %p3261_p0 = pnand %p3259_p13, %p3215_p3  ;;  %p3267_p6 = scmp.lt.s32.totalorder %s3265_s19, %s3258_s6 }
 0x106   : > { %p3262_p4 = pneg %p3261_p0  ;;  %p3268_p8 = por %p3267_p6, %p3266_p10 }
 0x108   : > { %p3269_p9 = pnand %p3268_p8, %p3262_p4 }
 0x10a   : > { %3272 = shalt.err (!%p3269_p9)
}
 0x10b   : > { %2724 = dma.hbm_to_vmem [thread:$0]  (!%p3712_p7), %s3756_s7, 512, %s3751_s20, %s3760_s3, %s3402_s9, %s3402_s9, %s3403_s15  }
 0x10c   : > { %s4498_s26 = sld [smem:[#allocation27_spill]] }
 0x112   : > { %p4499_p3 = scmp.ne.s32.totalorder %s4498_s26, 0 }
 0x114   : > { %391 = sbr.rel (%p4499_p3) target bundleno = 1243 (0x4db), region = 52 }
 0x11b   : > { %s3792_s25 = sand.u32 1, %s3367_s28  }
 0x11c   : > { %s2322_s4 = sshll.u32 %s3792_s25, 7  ;;  %s394_s21 = scalar_lea.sflag [#allocation4], %s3792_s25 }
 0x11d   : > { %s3798_s14 = scalar_lea.vmem [#allocation3], %s2322_s4 }
 0x11e   : > { %3334 = dma.done.wait (%p3677_p2), %s394_s21, 2048  }
 0x11f   : > { %3336 = vsyncadd (%p3677_p2), %s394_s21, 4294965248  ;;  %s402_s7 = sand.u32 1, %s3496_s13   ;;  %s2323_s9 = sshll.u32 %s3792_s25, 5 }
 0x120   : > { %s403_s15 = scalar_lea.sflag [#allocation7], %s402_s7  ;;  %s3806_s20 = scalar_lea.vmem [#allocation6], %s2323_s9 }
 0x121   : > { %3338 = dma.done.wait (%p3677_p2), %s403_s15, 512  }
 0x122   : > { %3340 = vsyncadd (%p3677_p2), %s403_s15, 4294966784  ;;  %p4500_p7 = scmp.eq.s32.totalorder %s3496_s13, 0 }
 0x124   : > { %3342 = dma.done.wait (%p4500_p7), [#allocation7], 1024   ;;  %p4501_p5 = pmov %p4500_p7 }
 0x126   : > { %3344 = vsyncadd (%p4501_p5), [#allocation7], 4294966272  ;;  %p4502_p1 = pmov %p4501_p5 }
 0x128   : > { %3346 = dma.done.wait (%p4502_p1), [#allocation10], 4624   ;;  %p4503_p11 = pmov %p4502_p1 }
 0x129   : > { %p4504_p12 = pmov %p4502_p1 }
 0x12a   : > { %3348 = vsyncadd (%p4503_p11), [#allocation10], 4294962672 }
 0x12b   : > { %3350 = dma.done.wait (%p4504_p12), [#allocation13], 528   ;;  %p4505_p13 = pmov %p4502_p1 }
 0x12c   : > { %p4506_p2 = pmov %p4502_p1 }
 0x12d   : > { %3352 = vsyncadd (%p4505_p13), [#allocation13], 4294966768 }
 0x12e   : > { %3354 = dma.done.wait (%p4506_p2), [#allocation16], 16   ;;  %p4507_p0 = pmov %p4502_p1 }
 0x12f   : > { %v2981_v0 = vld [vmem:[#allocation8] sm:$0xff]   ;;  %v2982_v1 = vld [vmem:[#allocation8 + $0x8] sm:$0xff]   ;;  %v2983_v2 = vld [vmem:[#allocation8 + $0x10] sm:$0xff]   ;;  %vm705_vm0 = vcmask 516096   ;;  %v3405_v38 = vmov 0.0   ;;  %s4508_s13 = sld [smem:[#allocation25_spill]] }
 0x130   : > { %3356 = vsyncadd (%p4507_p0), [#allocation16], 4294967280  ;;  %2577 = vmatprep.subr.bf16.mxu0 %v2981_v0  ;;  %v2984_v3 = vld [vmem:[#allocation8 + $0x18] sm:$0xff]   ;;  %v487_v4 = vld [vmem:[%s3806_s20] sm:$0xff]  ;;  %718 = vst.msk [vmem:[#allocation2 + $0x41] sm:$0x1] %vm705_vm0, %v3405_v38 }
 0x131   : > { %2578 = vmatpush3.bf16.msra.mxu0 %v2981_v0  ;;  %v488_v5 = vld [vmem:[%s3806_s20 + $0x8] sm:$0xff]  ;;  %v2985_v7 = vld [vmem:[#allocation8 + $0x20] sm:$0xff]   ;;  %v2987_v9 = vld [vmem:[#allocation8 + $0x30] sm:$0xff]   ;;  %706 = vst.msk [vmem:[#allocation2] sm:$0x1] %vm705_vm0, %v3405_v38  ;;  %vm726_vm1 = vcmask 523264  }
 0x132   : > { %2579 = vmatprep.subr.bf16.mxu0 %v2982_v1  ;;  %v491_v6 = vpack.c.bf16 %v488_v5, %v487_v4  ;;  %v2986_v8 = vld [vmem:[#allocation8 + $0x28] sm:$0xff]   ;;  %v2988_v10 = vld [vmem:[#allocation8 + $0x38] sm:$0xff]   ;;  %v471_v11 = vld [vmem:[%s3798_s14] sm:$0xff]  ;;  %707 = vst.msk [vmem:[#allocation2 + $0x18] sm:$0x1] %vm705_vm0, %v3405_v38  ;;  %s3406_s2 = smov 64  }
 0x133   : > { %v472_v12 = vld [vmem:[%s3798_s14 + $0x8] sm:$0xff]  ;;  %v473_v13 = vld [vmem:[%s3798_s14 + $0x10] sm:$0xff]  ;;  %v474_v14 = vld [vmem:[%s3798_s14 + $0x18] sm:$0xff]  ;;  %708 = vst.msk [vmem:[#allocation2 + $0x30] sm:$0x1] %vm705_vm0, %v3405_v38  ;;  %s4338_s0 = scalar_lea.vmem [#allocation17], %s2322_s4 }
 0x134   : > { %2593 = vmatprep.mubr.bf16.mxu0 %v491_v6  ;;  %v492_v15 = vpack.c.bf16 %v472_v12, %v471_v11  ;;  %v493_v16 = vpack.c.bf16 %v474_v14, %v473_v13  ;;  %v475_v17 = vld [vmem:[%s3798_s14 + $0x20] sm:$0xff]  ;;  %v476_v18 = vld [vmem:[%s3798_s14 + $0x28] sm:$0xff]  ;;  %v477_v19 = vld [vmem:[%s3798_s14 + $0x30] sm:$0xff]  ;;  %709 = vst.msk [vmem:[#allocation2 + $0x48] sm:$0x1] %vm705_vm0, %v3405_v38  ;;  %s4522_s6 = sld [smem:[#allocation26_spill]] }
 0x135   : > { %2580 = vmatpush3.bf16.msra.mxu0 %v2982_v1  ;;  %v478_v20 = vld [vmem:[%s3798_s14 + $0x38] sm:$0xff]  ;;  %v494_v21 = vpack.c.bf16 %v476_v18, %v475_v17  ;;  %v479_v23 = vld [vmem:[%s3798_s14 + $0x40] sm:$0xff]  ;;  %v480_v24 = vld [vmem:[%s3798_s14 + $0x48] sm:$0xff]  ;;  %710 = vst.msk [vmem:[#allocation2 + $0x60] sm:$0x1] %vm705_vm0, %v3405_v38  ;;  %p747_p4 = scmp.gt.s32.totalorder %s4508_s13, 0 }
 0x136   : > { %2581 = vmatprep.subr.bf16.mxu0 %v2983_v2  ;;  %v495_v22 = vpack.c.bf16 %v478_v20, %v477_v19  ;;  %v481_v25 = vld [vmem:[%s3798_s14 + $0x50] sm:$0xff]  ;;  %v482_v26 = vld [vmem:[%s3798_s14 + $0x58] sm:$0xff]  ;;  %v496_v27 = vpack.c.bf16 %v480_v24, %v479_v23  ;;  %v483_v29 = vld [vmem:[%s3798_s14 + $0x60] sm:$0xff]  ;;  %711 = vst.msk [vmem:[#allocation2 + $0x78] sm:$0x1] %vm705_vm0, %v3405_v38  ;;  %p750_p10 = scmp.lt.s32.totalorder %s4508_s13, 1 }
 0x137   : > { %v497_v28 = vpack.c.bf16 %v482_v26, %v481_v25  ;;  %v484_v30 = vld [vmem:[%s3798_s14 + $0x68] sm:$0xff]  ;;  %v485_v31 = vld [vmem:[%s3798_s14 + $0x70] sm:$0xff]  ;;  %v486_v32 = vld [vmem:[%s3798_s14 + $0x78] sm:$0xff]  ;;  %712 = vst.msk [vmem:[#allocation2 + $0x90] sm:$0x1] %vm705_vm0, %v3405_v38  ;;  %s2406_s17 = sshll.u32 %s4508_s13, 4 }
 0x138   : > { %v498_v33 = vpack.c.bf16 %v484_v30, %v483_v29  ;;  %v499_v34 = vpack.c.bf16 %v486_v32, %v485_v31  ;;  %v489_v35 = vld [vmem:[%s3806_s20 + $0x10] sm:$0xff]  ;;  %v490_v36 = vld [vmem:[%s3806_s20 + $0x18] sm:$0xff]  ;;  %713 = vst.msk [vmem:[#allocation2 + $0xa8] sm:$0x1] %vm705_vm0, %v3405_v38  ;;  %714 = vst.msk [vmem:[#allocation2 + $0xc0] sm:$0x1] %vm705_vm0, %v3405_v38 }
 0x139   : > { %2582 = vmatpush3.bf16.msra.mxu0 %v2983_v2  ;;  %v500_v37 = vpack.c.bf16 %v490_v36, %v489_v35  ;;  %715 = vst.msk [vmem:[#allocation2 + $0xd8] sm:$0x1] %vm705_vm0, %v3405_v38  ;;  %716 = vst.msk [vmem:[#allocation2 + $0x11] sm:$0x1] %vm705_vm0, %v3405_v38  ;;  %v2989_v39 = vld [vmem:[#allocation11 + $0xc0] sm:$0xff]   ;;  %v2991_v41 = vld [vmem:[#allocation11 + $0xc8] sm:$0xff]  }
 0x13a   : > { %2583 = vmatprep.subr.bf16.mxu0 %v2984_v3  ;;  %717 = vst.msk [vmem:[#allocation2 + $0x29] sm:$0x1] %vm705_vm0, %v3405_v38  ;;  %719 = vst.msk [vmem:[#allocation2 + $0x59] sm:$0x1] %vm705_vm0, %v3405_v38  ;;  %v2990_v40 = vld [vmem:[#allocation11 + $0x80] sm:$0xff]   ;;  %v2992_v43 = vld [vmem:[#allocation11 + $0x88] sm:$0xff]  }
 0x13b   : > { %720 = vst.msk [vmem:[#allocation2 + $0x71] sm:$0x1] %vm705_vm0, %v3405_v38  ;;  %721 = vst.msk [vmem:[#allocation2 + $0x89] sm:$0x1] %vm705_vm0, %v3405_v38  ;;  %v2997_v42 = vld [vmem:[#allocation11 + $0x40] sm:$0xff]   ;;  %v3000_v45 = vld [vmem:[#allocation11 + $0x48] sm:$0xff]  }
 0x13c   : > { %722 = vst.msk [vmem:[#allocation2 + $0xa1] sm:$0x1] %vm705_vm0, %v3405_v38  ;;  %723 = vst.msk [vmem:[#allocation2 + $0xb9] sm:$0x1] %vm705_vm0, %v3405_v38  ;;  %v2998_v44 = vld [vmem:[#allocation11] sm:$0xff]   ;;  %v2993_v46 = vld [vmem:[#allocation11 + $0xd0] sm:$0xff]   ;;  %2425 = vmatprep.subr.bf16.mxu1 %v2997_v42 }
 0x13d   : > { %2584 = vmatpush3.bf16.msra.mxu0 %v2984_v3  ;;  %724 = vst.msk [vmem:[#allocation2 + $0xd1] sm:$0x1] %vm705_vm0, %v3405_v38  ;;  %725 = vst.msk [vmem:[#allocation2 + $0xe9] sm:$0x1] %vm705_vm0, %v3405_v38  ;;  %2426 = vmatpush3.bf16.msra.mxu1 %v2998_v44  ;;  %v3002_v47 = vld [vmem:[#allocation11 + $0x8] sm:$0xff]   ;;  %v3003_v48 = vld [vmem:[#allocation11 + $0x50] sm:$0xff]  }
 0x13e   : > { %2585 = vmatprep.subr.bf16.mxu0 %v2985_v7  ;;  %2427 = vmatprep.subr.bf16.mxu1 %v3000_v45  ;;  %v2994_v49 = vld [vmem:[#allocation11 + $0x90] sm:$0xff]   ;;  %v2995_v50 = vld [vmem:[#allocation11 + $0xd8] sm:$0xff]   ;;  %v2999_v54 = vld [vmem:[#allocation11 + $0xe0] sm:$0xff]   ;;  %s748_s22 = scalar_select %p747_p4, 1, 0 }
 0x13f   : > { %v3005_v51 = vld [vmem:[#allocation11 + $0x10] sm:$0xff]   ;;  %v3007_v52 = vld [vmem:[#allocation11 + $0x58] sm:$0xff]   ;;  %v3001_v56 = vld [vmem:[#allocation11 + $0xa0] sm:$0xff]   ;;  %s3933_s24 = scalar_select %p750_p10, 1, 0 }
 0x140   : > { %v2996_v53 = vld [vmem:[#allocation11 + $0x98] sm:$0xff]   ;;  %v3004_v57 = vld [vmem:[#allocation11 + $0xe8] sm:$0xff]   ;;  %v3009_v59 = vld [vmem:[#allocation11 + $0xf0] sm:$0xff]   ;;  %s749_s3 = scvt.s32.f32 %s748_s22  ;;  %s2401_s8 = sshll.u32 %s4522_s6, 5 }
 0x141   : > { %2586 = vmatpush3.bf16.msra.mxu0 %v2985_v7  ;;  %2428 = vmatpush3.bf16.msra.mxu1 %v3002_v47  ;;  %v3008_v55 = vld [vmem:[#allocation11 + $0x18] sm:$0xff]   ;;  %v3006_v58 = vld [vmem:[#allocation11 + $0xa8] sm:$0xff]   ;;  %v3011_v24 = vld [vmem:[#allocation11 + $0x60] sm:$0xff]   ;;  %s752_s5 = scvt.s32.f32 %s3933_s24  ;;  %s2126_s19 = sadd.s32 %s2406_s17, %s2401_s8 }
 0x142   : > { %2587 = vmatprep.subr.bf16.mxu0 %v2986_v8  ;;  %2429 = vmatprep.subr.bf16.mxu1 %v3003_v48  ;;  %v3869_v60 = vld [vmem:[#allocation9] ss:$0 sm:$0xff]  ;;  %v753_v3 = vstv %s749_s3  ;;  %v3012_v25 = vld [vmem:[#allocation11 + $0x20] sm:$0xff]   ;;  %v3016_v38 = vld [vmem:[#allocation11 + $0x28] sm:$0xff]   ;;  %s2129_s26 = sshll.u32 %s4338_s0, 4  ;;  %s2402_s4 = sshll.u32 %s2126_s19, 7  ;;  %s4380_s26 = int_to_ptr.vmem [resolvable:$true] %s2129_s26 }
 0x143   : > { %v3894_v42 = vld [vmem:[#allocation11 + $0x100] sm:$0xff]   ;;  %s4523_s9 = sld [smem:[#allocation42_spill]]  ;;  %s2113_s13 = scalar_lea.sflag [#allocation5], %s3792_s25 }
 0x144   : > { %s3273_s22 = scalar_lea.vmem %s4380_s26, 2048  ;;  %p4525_p8 = scmp.ne.s32.totalorder %s4493_s16, 0 }
 0x145   : > { %2588 = vmatpush3.bf16.msra.mxu0 %v2986_v8  ;;  %2430 = vmatpush3.bf16.msra.mxu1 %v3005_v51  ;;  %p3274_p6 = scmp.ne.s32.totalorder %s4380_s26, %s3273_s22 }
 0x146   : > { %2589 = vmatprep.subr.bf16.mxu0 %v2987_v9  ;;  %2431 = vmatprep.subr.bf16.mxu1 %v3007_v52 }
 0x147   : > { %p3275_p9 = pnand %p3274_p6, %p4525_p8 }
 0x149   : > { %2590 = vmatpush3.bf16.msra.mxu0 %v2987_v9  ;;  %2432 = vmatpush3.bf16.msra.mxu1 %v3008_v55  ;;  %s4524_s15 = smov %s4523_s9  ;;  %s4386_s20 = scalar_lea.hbm %s4523_s9, %s2402_s4 }
 0x14a   : > { %2591 = vmatprep.subr.bf16.mxu0 %v2988_v10  ;;  %2433 = vmatprep.subr.bf16.mxu1 %v3011_v24  ;;  %p3276_p3 = pneg %p3275_p9 }
 0x14d   : > { %2592 = vmatpush3.bf16.msra.mxu0 %v2988_v10  ;;  %2434 = vmatpush3.bf16.msra.mxu1 %v3012_v25 }
 0x14e   : > { %2489 = vmatprep.subr.bf16.mxu0 %v2989_v39 }
 0x150   : > { %2594 = vmatmul.mubr.bf16.vlgmr.msra.gmra.mrb[0].mxu0 %v492_v15 }
 0x151   : > { %2597 = vmatprep.mubr.bf16.mxu0 %v493_v16  ;;  %2490 = vmatpush3.bf16.msra.mxu0 %v2990_v40 }
 0x152   : > { %2491 = vmatprep.subr.bf16.mxu0 %v2991_v41 }
 0x155   : > { %2492 = vmatpush3.bf16.msra.mxu0 %v2992_v43 }
 0x156   : > { %2493 = vmatprep.subr.bf16.mxu0 %v2993_v46 }
 0x158   : > { %2598 = vmatmul.mubr.bf16.gmra.mrb[4].mxu0 %v494_v21 }
 0x159   : > { %2601 = vmatprep.mubr.bf16.mxu0 %v495_v22  ;;  %2494 = vmatpush3.bf16.msra.mxu0 %v2994_v49  ;;  %v3010_v22 = vld [vmem:[#allocation11 + $0xb0] sm:$0xff]  }
 0x15a   : > { %2495 = vmatprep.subr.bf16.mxu0 %v2995_v50 }
 0x15d   : > { %2496 = vmatpush3.bf16.msra.mxu0 %v2996_v53 }
 0x15e   : > { %2497 = vmatprep.subr.bf16.mxu0 %v2999_v54  ;;  %v3018_v54 = vld [vmem:[#allocation11 + $0x70] sm:$0xff]  }
 0x160   : > { %2602 = vmatmul.mubr.bf16.gmra.mrb[8].mxu0 %v496_v27 }
 0x161   : > { %2605 = vmatprep.mubr.bf16.mxu0 %v497_v28  ;;  %2498 = vmatpush3.bf16.msra.mxu0 %v3001_v56  ;;  %v3013_v28 = vld [vmem:[#allocation11 + $0xf8] sm:$0xff]  }
 0x162   : > { %2499 = vmatprep.subr.bf16.mxu0 %v3004_v57 }
 0x165   : > { %2500 = vmatpush3.bf16.msra.mxu0 %v3006_v58  ;;  %v3019_v58 = vld [vmem:[#allocation11 + $0x30] sm:$0xff]  }
 0x166   : > { %2501 = vmatprep.subr.bf16.mxu0 %v3009_v59  ;;  %v3020_v59 = vld [vmem:[#allocation11 + $0x78] sm:$0xff]  }
 0x168   : > { %2606 = vmatmul.mubr.bf16.gmra.mrb[12].mxu0 %v498_v33  ;;  %v3015_v33 = vld [vmem:[#allocation11 + $0x68] sm:$0xff]  }
 0x169   : > { %2609 = vmatprep.mubr.bf16.mxu0 %v499_v34  ;;  %2502 = vmatpush3.bf16.msra.mxu0 %v3010_v22 }
 0x16a   : > { %2503 = vmatprep.subr.bf16.mxu0 %v3013_v28  ;;  %2435 = vmatprep.subr.bf16.mxu1 %v3015_v33 }
 0x16b   : > { %2436 = vmatpush3.bf16.msra.mxu1 %v3016_v38 }
 0x16c   : > { %2437 = vmatprep.subr.bf16.mxu1 %v3018_v54 }
 0x16f   : > { %2438 = vmatpush3.bf16.msra.mxu1 %v3019_v58 }
 0x170   : > { %2610 = vmatmul.mubr.bf16.gmra.mrb[16].mxu0 %v500_v37  ;;  %v3014_v37 = vld [vmem:[#allocation11 + $0xb8] sm:$0xff]   ;;  %2439 = vmatprep.subr.bf16.mxu1 %v3020_v59 }
 0x171   : > { %2504 = vmatpush3.bf16.msra.mxu0 %v3014_v37 }
 0x172   : > { %2613 = vmatprep.subr.bf16.mxu0 %v3894_v42 }
 0x223   : > { %v2595_v61 = vpop.f32.mrb[0].mxu0 }
 0x224   : > { %v615_v62 = vadd.f32 %v2595_v61, %v3869_v60  ;;  %v606_v63 = vpop.f32.mrb[1].mxu0 }
 0x225   : > { %v607_v0 = vadd.f32 %v3869_v60, %v606_v63  ;;  %v2596_v1 = vpop.f32.mrb[2].mxu0 }
 0x226   : > { %v687_v2 = vmax.f32 %v615_v62, 0.0  ;;  %v618_v4 = vadd.f32 %v2596_v1, %v3869_v60  ;;  %v609_v5 = vpop.f32.mrb[3].mxu0 }
 0x227   : > { %v685_v6 = vmax.f32 %v607_v0, 0.0  ;;  %v610_v7 = vadd.f32 %v3869_v60, %v609_v5 }
 0x228   : > { %729 = vst.msk [vmem:[#allocation2 + $0x19] sm:$0xff] %vm726_vm1, %v687_v2  ;;  %v688_v8 = vmax.f32 %v618_v4, 0.0 }
 0x229   : > { %727 = vst.msk [vmem:[#allocation2 + $0x1] sm:$0xff] %vm726_vm1, %v685_v6  ;;  %v754_v9 = vmul.f32 %v753_v3, %v685_v6  ;;  %v686_v10 = vmax.f32 %v610_v7, 0.0 }
 0x22a   : > { %730 = vst.msk [vmem:[#allocation2 + $0x21] sm:$0xff] %vm726_vm1, %v688_v8 }
 0x22b   : > { %756 = vst.msk [vmem:[#allocation2 + $0x1] sm:$0xff] %vm726_vm1, %v754_v9  ;;  %728 = vst.msk [vmem:[#allocation2 + $0x9] sm:$0xff] %vm726_vm1, %v686_v10  ;;  %v755_v11 = vmul.f32 %v753_v3, %v686_v10  ;;  %v2599_v12 = vpop.f32.mrb[4].mxu0  ;;  %v3021_v3 = vld [vmem:[#allocation11 + $0x38] sm:$0xff]  }
 0x22c   : > { %v631_v13 = vadd.f32 %v2599_v12, %v3869_v60  ;;  %v622_v14 = vpop.f32.mrb[5].mxu0  ;;  %2440 = vmatpush3.bf16.msra.mxu1 %v3021_v3 }
 0x22d   : > { %757 = vst.msk [vmem:[#allocation2 + $0x9] sm:$0xff] %vm726_vm1, %v755_v11  ;;  %v623_v15 = vadd.f32 %v3869_v60, %v622_v14  ;;  %v2600_v16 = vpop.f32.mrb[6].mxu0  ;;  %2661 = vmatprep.subr.bf16.mxu1 %v3894_v42 }
 0x22e   : > { %v691_v17 = vmax.f32 %v631_v13, 0.0  ;;  %v634_v18 = vadd.f32 %v2600_v16, %v3869_v60  ;;  %v625_v19 = vpop.f32.mrb[7].mxu0 }
 0x22f   : > { %v689_v20 = vmax.f32 %v623_v15, 0.0  ;;  %v626_v21 = vadd.f32 %v3869_v60, %v625_v19  ;;  %v3951_v11 = vld [vmem:[#allocation2 + $0x18] sm:$0xff] }
 0x230   : > { %733 = vst.msk [vmem:[#allocation2 + $0x49] sm:$0xff] %vm726_vm1, %v691_v17  ;;  %v692_v23 = vmax.f32 %v634_v18, 0.0  ;;  %v4007_v54 = vld [vmem:[#allocation2 + $0x19] sm:$0xff] }
 0x231   : > { %731 = vst.msk [vmem:[#allocation2 + $0x31] sm:$0xff] %vm726_vm1, %v689_v20  ;;  %v690_v26 = vmax.f32 %v626_v21, 0.0  ;;  %v3911_v49 = vld [vmem:[#allocation2 + $0x1a] sm:$0xff]  ;;  %v3925_v55 = vld [vmem:[#allocation2 + $0x22] sm:$0xff]  ;;  %v758_v21 = vstv %s752_s5 }
 0x232   : > { %734 = vst.msk [vmem:[#allocation2 + $0x51] sm:$0xff] %vm726_vm1, %v692_v23  ;;  %v2826_v4 = vpack.i.bf16 %v3925_v55, %v3911_v49  ;;  %v3943_v8 = vld [vmem:[#allocation2 + $0x20] sm:$0xff] }
 0x233   : > { %732 = vst.msk [vmem:[#allocation2 + $0x39] sm:$0xff] %vm726_vm1, %v690_v26  ;;  %v2603_v27 = vpop.f32.mrb[8].mxu0  ;;  %v2836_v13 = vpack.i.bf16 %v3943_v8, %v3951_v11  ;;  %v780_v24 = vld [vmem:[#allocation2 + $0x1] sm:$0xff] }
 0x234   : > { %v647_v29 = vadd.f32 %v2603_v27, %v3869_v60  ;;  %v638_v30 = vpop.f32.mrb[9].mxu0  ;;  %v781_v18 = vld [vmem:[#allocation2 + $0x9] sm:$0xff] }
 0x235   : > { %v639_v31 = vadd.f32 %v3869_v60, %v638_v30  ;;  %v2604_v32 = vpop.f32.mrb[10].mxu0 }
 0x236   : > { %v695_v34 = vmax.f32 %v647_v29, 0.0  ;;  %v650_v35 = vadd.f32 %v2604_v32, %v3869_v60  ;;  %v641_v36 = vpop.f32.mrb[11].mxu0  ;;  %v2841_v29 = vpack.i.bf16 %v781_v18, %v780_v24 }
 0x237   : > { %v693_v39 = vmax.f32 %v639_v31, 0.0  ;;  %v642_v40 = vadd.f32 %v3869_v60, %v641_v36  ;;  %v3897_v44 = vld [vmem:[#allocation2 + $0x49] sm:$0xff] }
 0x238   : > { %737 = vst.msk [vmem:[#allocation2 + $0x79] sm:$0xff] %vm726_vm1, %v695_v34  ;;  %v696_v41 = vmax.f32 %v650_v35, 0.0  ;;  %v3907_v47 = vld [vmem:[#allocation2 + $0x31] sm:$0xff] }
 0x239   : > { %735 = vst.msk [vmem:[#allocation2 + $0x61] sm:$0xff] %vm726_vm1, %v693_v39  ;;  %v694_v43 = vmax.f32 %v642_v40, 0.0  ;;  %v3899_v45 = vld [vmem:[#allocation2 + $0x51] sm:$0xff] }
 0x23a   : > { %738 = vst.msk [vmem:[#allocation2 + $0x81] sm:$0xff] %vm726_vm1, %v696_v41  ;;  %v3905_v46 = vpack.i.bf16 %v3899_v45, %v3897_v44  ;;  %v3909_v48 = vld [vmem:[#allocation2 + $0x39] sm:$0xff]  ;;  %v3963_v16 = vld [vmem:[#allocation2 + $0x4a] sm:$0xff] }
 0x23b   : > { %736 = vst.msk [vmem:[#allocation2 + $0x69] sm:$0xff] %vm726_vm1, %v694_v43  ;;  %v3917_v50 = vpack.i.bf16 %v3909_v48, %v3907_v47  ;;  %v3919_v51 = vld [vmem:[#allocation2 + $0x32] sm:$0xff]  ;;  %v3921_v52 = vld [vmem:[#allocation2 + $0x3a] sm:$0xff]  ;;  %v2607_v53 = vpop.f32.mrb[12].mxu0 }
 0x23c   : > { %2832 = vrot.lane.b32.xlu1 %v3905_v46, %s3406_s2  ;;  %v663_v56 = vadd.f32 %v2607_v53, %v3869_v60  ;;  %v654_v57 = vpop.f32.mrb[13].mxu0  ;;  %v2846_v63 = vpack.i.bf16 %v3921_v52, %v3919_v51  ;;  %v3965_v17 = vld [vmem:[#allocation2 + $0x52] sm:$0xff]  ;;  %v4001_v53 = vld [vmem:[#allocation2 + $0x21] sm:$0xff] }
 0x23d   : > { %2822 = vrot.lane.b32.xlu0 %v3917_v50, %s3406_s2  ;;  %v655_v61 = vadd.f32 %v3869_v60, %v654_v57  ;;  %v2608_v62 = vpop.f32.mrb[14].mxu0  ;;  %v2856_v28 = vpack.i.bf16 %v3965_v17, %v3963_v16  ;;  %v3980_v34 = vld [vmem:[#allocation2 + $0x38] sm:$0xff]  ;;  %v3986_v38 = vld [vmem:[#allocation2 + $0x30] sm:$0xff]  ;;  %v2871_v59 = vpack.i.bf16 %v4001_v53, %v4007_v54 }
 0x23e   : > { %v699_v0 = vmax.f32 %v663_v56, 0.0  ;;  %v666_v1 = vadd.f32 %v2608_v62, %v3869_v60  ;;  %v657_v2 = vpop.f32.mrb[15].mxu0  ;;  %v2861_v40 = vpack.i.bf16 %v3980_v34, %v3986_v38 }
 0x23f   : > { %v697_v5 = vmax.f32 %v655_v61, 0.0  ;;  %v658_v6 = vadd.f32 %v3869_v60, %v657_v2  ;;  %v3976_v32 = vld [vmem:[#allocation2 + $0x79] sm:$0xff]  ;;  %v4017_v61 = vld [vmem:[#allocation2 + $0x50] sm:$0xff] }
 0x240   : > { %2847 = vrot.lane.b32.xlu1 %v2846_v63, %s3406_s2  ;;  %741 = vst.msk [vmem:[#allocation2 + $0xa9] sm:$0xff] %vm726_vm1, %v699_v0  ;;  %v700_v7 = vmax.f32 %v666_v1, 0.0  ;;  %v3945_v9 = vld [vmem:[#allocation2 + $0x61] sm:$0xff]  ;;  %v4068_v24 = vld [vmem:[#allocation2 + $0x78] sm:$0xff] }
 0x241   : > { %2827 = vrot.lane.b32.xlu0 %v2826_v4, %s3406_s2  ;;  %739 = vst.msk [vmem:[#allocation2 + $0x91] sm:$0xff] %vm726_vm1, %v697_v5  ;;  %v698_v10 = vmax.f32 %v658_v6, 0.0  ;;  %v3978_v33 = vld [vmem:[#allocation2 + $0x81] sm:$0xff] }
 0x242   : > { %742 = vst.msk [vmem:[#allocation2 + $0xb1] sm:$0xff] %vm726_vm1, %v700_v7  ;;  %v3953_v12 = vld [vmem:[#allocation2 + $0x69] sm:$0xff]  ;;  %v3992_v39 = vpack.i.bf16 %v3978_v33, %v3976_v32  ;;  %v4033_v4 = vld [vmem:[#allocation2 + $0x7a] sm:$0xff] }
 0x243   : > { %v3959_v14 = vpack.i.bf16 %v3953_v12, %v3945_v9  ;;  %740 = vst.msk [vmem:[#allocation2 + $0x99] sm:$0xff] %vm726_vm1, %v698_v10  ;;  %v2611_v15 = vpop.f32.mrb[16].mxu0  ;;  %v3997_v41 = vld [vmem:[#allocation2 + $0x62] sm:$0xff]  ;;  %v3999_v43 = vld [vmem:[#allocation2 + $0x6a] sm:$0xff] }
 0x244   : > { %v679_v19 = vadd.f32 %v2611_v15, %v3869_v60  ;;  %v670_v20 = vpop.f32.mrb[17].mxu0  ;;  %v2886_v58 = vpack.i.bf16 %v3999_v43, %v3997_v41  ;;  %v4023_v63 = vld [vmem:[#allocation2 + $0x48] sm:$0xff]  ;;  %v4041_v7 = vld [vmem:[#allocation2 + $0x60] sm:$0xff] }
 0x245   : > { %2837 = vrot.lane.b32.xlu0 %v2836_v13, %s3406_s2  ;;  %2852 = vrot.lane.b32.xlu1 %v3959_v14, %s3406_s2  ;;  %v671_v22 = vadd.f32 %v3869_v60, %v670_v20  ;;  %v2612_v23 = vpop.f32.mrb[18].mxu0  ;;  %v2876_v2 = vpack.i.bf16 %v4017_v61, %v4023_v63  ;;  %v4035_v5 = vld [vmem:[#allocation2 + $0x82] sm:$0xff] }
 0x246   : > { %v703_v25 = vmax.f32 %v679_v19, 0.0  ;;  %v682_v26 = vadd.f32 %v2612_v23, %v3869_v60  ;;  %v673_v27 = vpop.f32.mrb[19].mxu0  ;;  %v2896_v6 = vpack.i.bf16 %v4035_v5, %v4033_v4  ;;  %v4047_v15 = vld [vmem:[#allocation2 + $0x68] sm:$0xff] }
 0x247   : > { %v701_v30 = vmax.f32 %v671_v22, 0.0  ;;  %v674_v31 = vadd.f32 %v3869_v60, %v673_v27  ;;  %v4043_v10 = vld [vmem:[#allocation2 + $0xa9] sm:$0xff]  ;;  %v2901_v19 = vpack.i.bf16 %v4047_v15, %v4041_v7 }
 0x248   : > { %745 = vst.msk [vmem:[#allocation2 + $0xd9] sm:$0xff] %vm726_vm1, %v703_v25  ;;  %v759_v35 = vmul.f32 %v758_v21, %v703_v25  ;;  %v704_v36 = vmax.f32 %v682_v26, 0.0  ;;  %v4009_v56 = vld [vmem:[#allocation2 + $0x91] sm:$0xff]  ;;  %v4070_v25 = vld [vmem:[#allocation2 + $0x80] sm:$0xff] }
 0x249   : > { %2857 = vrot.lane.b32.xlu1 %v2856_v28, %s3406_s2  ;;  %2842 = vrot.lane.b32.xlu0 %v2841_v29, %s3406_s2  ;;  %743 = vst.msk [vmem:[#allocation2 + $0xc1] sm:$0xff] %vm726_vm1, %v701_v30  ;;  %v702_v37 = vmax.f32 %v674_v31, 0.0  ;;  %v4045_v13 = vld [vmem:[#allocation2 + $0xb1] sm:$0xff]  ;;  %v2916_v27 = vpack.i.bf16 %v4070_v25, %v4068_v24 }
 0x24a   : > { %762 = vst.msk [vmem:[#allocation2 + $0xd9] sm:$0xff] %vm726_vm1, %v759_v35  ;;  %746 = vst.msk [vmem:[#allocation2 + $0xe1] sm:$0xff] %vm726_vm1, %v704_v36  ;;  %v760_v60 = vmul.f32 %v758_v21, %v704_v36  ;;  %v4011_v57 = vld [vmem:[#allocation2 + $0x99] sm:$0xff]  ;;  %v2906_v18 = vpack.i.bf16 %v4045_v13, %v4043_v10  ;;  %v4079_v28 = vld [vmem:[#allocation2 + $0xaa] sm:$0xff] }
 0x24b   : > { %744 = vst.msk [vmem:[#allocation2 + $0xc9] sm:$0xff] %vm726_vm1, %v702_v37  ;;  %v2891_v62 = vpack.i.bf16 %v4011_v57, %v4009_v56  ;;  %v4056_v20 = vld [vmem:[#allocation2 + $0x92] sm:$0xff]  ;;  %v4058_v21 = vld [vmem:[#allocation2 + $0x9a] sm:$0xff]  ;;  %4513 = vst [vmem:[#allocation33_spill] sm:$0xff] %v4079_v28 }
 0x24c   : > { %763 = vst.msk [vmem:[#allocation2 + $0xe1] sm:$0xff] %vm726_vm1, %v760_v60  ;;  %v4081_v29 = vld [vmem:[#allocation2 + $0xb2] sm:$0xff] }
 0x24d   : > { %2867 = vrot.lane.b32.xlu1 %v3992_v39, %s3406_s2  ;;  %2862 = vrot.lane.b32.xlu0 %v2861_v40, %s3406_s2  ;;  %4514 = vst [vmem:[#allocation34_spill] sm:$0xff] %v4081_v29  ;;  %v2936_v35 = vpack.i.bf16 %v4081_v29, %v4079_v28  ;;  %v4089_v36 = vld [vmem:[#allocation2 + $0x98] sm:$0xff] }
 0x250   : > { %v4062_v22 = vld [vmem:[#allocation2 + $0xc1] sm:$0xff] }
 0x251   : > { %2887 = vrot.lane.b32.xlu1 %v2886_v58, %s3406_s2  ;;  %2872 = vrot.lane.b32.xlu0 %v2871_v59, %s3406_s2  ;;  %4511 = vst [vmem:[#allocation31_spill] sm:$0xff] %v4062_v22  ;;  %v892_v30 = vld [vmem:[#allocation2 + $0xd9] sm:$0xff]  ;;  %v4100_v58 = vld [vmem:[#allocation2 + $0xa8] sm:$0xff]  ;;  %v4102_v59 = vld [vmem:[#allocation2 + $0xb0] sm:$0xff] }
 0x252   : > { %v4025_v0 = vld [vmem:[#allocation2 + $0xc2] sm:$0xff]  ;;  %v4027_v1 = vld [vmem:[#allocation2 + $0xca] sm:$0xff] }
 0x253   : > { %4509 = vst [vmem:[#allocation29_spill] sm:$0xff] %v4025_v0  ;;  %4510 = vst [vmem:[#allocation30_spill] sm:$0xff] %v4027_v1  ;;  %v4064_v23 = vld [vmem:[#allocation2 + $0xc9] sm:$0xff]  ;;  %v893_v31 = vld [vmem:[#allocation2 + $0xe1] sm:$0xff]  ;;  %v2956_v40 = vpack.i.bf16 %v4027_v1, %v4025_v0 }
 0x254   : > { %4512 = vst [vmem:[#allocation32_spill] sm:$0xff] %v4064_v23  ;;  %v2931_v26 = vpack.i.bf16 %v4064_v23, %v4062_v22  ;;  %v2951_v37 = vpack.i.bf16 %v893_v31, %v892_v30  ;;  %v3024_v22 = vld [vmem:[#allocation11 + $0x118] sm:$0xff]  }
 0x255   : > { %2892 = vrot.lane.b32.xlu1 %v2891_v62, %s3406_s2  ;;  %2877 = vrot.lane.b32.xlu0 %v2876_v2, %s3406_s2  ;;  %v4109_v2 = vld [vmem:[#allocation2 + $0xc0] sm:$0xff] }
 0x259   : > { %2897 = vrot.lane.b32.xlu1 %v2896_v6, %s3406_s2  ;;  %2882 = vrot.lane.b32.xlu0 %v3917_v50, %s3406_s2  ;;  %v2926_v50 = vpack.i.bf16 %v4058_v21, %v4056_v20  ;;  %v4111_v6 = vld [vmem:[#allocation2 + $0xc8] sm:$0xff] }
 0x25d   : > { %2907 = vrot.lane.b32.xlu1 %v2906_v18, %s3406_s2  ;;  %2902 = vrot.lane.b32.xlu0 %v2901_v19, %s3406_s2  ;;  %v2971_v19 = vpack.i.bf16 %v4111_v6, %v4109_v2 }
 0x261   : > { %2927 = vrot.lane.b32.xlu1 %v2926_v50, %s3406_s2  ;;  %2912 = vrot.lane.b32.xlu0 %v3905_v46, %s3406_s2  ;;  %v4087_v46 = vld [vmem:[#allocation2 + $0x90] sm:$0xff] }
 0x262   : > { %v2941_v60 = vpack.i.bf16 %v4089_v36, %v4087_v46 }
 0x265   : > { %2932 = vrot.lane.b32.xlu1 %v2931_v26, %s3406_s2  ;;  %2917 = vrot.lane.b32.xlu0 %v2916_v27, %s3406_s2 }
 0x269   : > { %2937 = vrot.lane.b32.xlu1 %v2936_v35, %s3406_s2  ;;  %2922 = vrot.lane.b32.xlu0 %v3959_v14, %s3406_s2  ;;  %v2961_v14 = vpack.i.bf16 %v4102_v59, %v4100_v58 }
 0x26d   : > { %2952 = vrot.lane.b32.xlu1 %v2951_v37, %s3406_s2  ;;  %2942 = vrot.lane.b32.xlu0 %v2941_v60, %s3406_s2 }
 0x271   : > { %2957 = vrot.lane.b32.xlu1 %v2956_v40, %s3406_s2  ;;  %2947 = vrot.lane.b32.xlu0 %v3992_v39, %s3406_s2 }
 0x275   : > { %2967 = vrot.lane.b32.xlu1 %v2891_v62, %s3406_s2  ;;  %2962 = vrot.lane.b32.xlu0 %v2961_v14, %s3406_s2 }
 0x279   : > { %2977 = vrot.lane.b32.xlu1 %v2906_v18, %s3406_s2  ;;  %2972 = vrot.lane.b32.xlu0 %v2971_v19, %s3406_s2 }
 0x2ae   : > { %v2833_v50 = vpop.permute.xlu1 %2832 }
 0x2af   : > { %v2823_v39 = vpop.permute.xlu0 %2822  ;;  %v2835_v26 = vunpack.i.h.bf16 %v2833_v50  ;;  %v2834_v27 = vunpack.i.l.bf16 %v2833_v50 }
 0x2b0   : > { %v2825_v30 = vunpack.i.h.bf16 %v2823_v39  ;;  %v2824_v31 = vunpack.i.l.bf16 %v2823_v39 }
 0x2b1   : > { %v1216_v18 = vsel %vm726_vm1, %v4023_v63, %v2834_v27  ;;  %v1217_v19 = vsel %vm726_vm1, %v4017_v61, %v2835_v26  ;;  %v796_v26 = vld [vmem:[#allocation2 + $0x2] sm:$0xff] }
 0x2b2   : > { %v2848_v35 = vpop.permute.xlu1 %2847  ;;  %v1214_v37 = vsel %vm726_vm1, %v3986_v38, %v2824_v31  ;;  %v1215_v62 = vsel %vm726_vm1, %v3980_v34, %v2825_v30 }
 0x2b3   : > { %v2828_v60 = vpop.permute.xlu0 %2827  ;;  %v1233_v40 = vpack.c.bf16 %v1215_v62, %v1214_v37  ;;  %v2850_v31 = vunpack.i.h.bf16 %v2848_v35  ;;  %v2849_v0 = vunpack.i.l.bf16 %v2848_v35  ;;  %v1238_v62 = vpack.c.bf16 %v1217_v19, %v1216_v18  ;;  %v4141_v19 = vld [vmem:[#allocation11 + $0x110] sm:$0xff]  }
 0x2b4   : > { %v2830_v14 = vunpack.i.h.bf16 %v2828_v60  ;;  %v2829_v3 = vunpack.i.l.bf16 %v2828_v60  ;;  %v4131_v60 = vld [vmem:[#allocation11 + $0x108] sm:$0xff]  }
 0x2b5   : > { %1718 = vmatprep.mubr.bf16.mxu0 %v1233_v40  ;;  %v797_v40 = vld [vmem:[#allocation2 + $0xa] sm:$0xff]  ;;  %v1200_v18 = vsel %vm726_vm1, %v3907_v47, %v2849_v0 }
 0x2b6   : > { %v1199_v50 = vsel %vm726_vm1, %v4001_v53, %v2830_v14  ;;  %v1198_v39 = vsel %vm726_vm1, %v4007_v54, %v2829_v3 }
 0x2b7   : > { %v1232_v30 = vpack.c.bf16 %v1199_v50, %v1198_v39  ;;  %v2838_v1 = vpop.permute.xlu0 %2837  ;;  %v2853_v37 = vpop.permute.xlu1 %2852 }
 0x2b8   : > { %v2840_v29 = vunpack.i.h.bf16 %v2838_v1  ;;  %v2839_v27 = vunpack.i.l.bf16 %v2838_v1  ;;  %v2855_v28 = vunpack.i.h.bf16 %v2853_v37  ;;  %v2854_v23 = vunpack.i.l.bf16 %v2853_v37  ;;  %v764_v37 = vld [vmem:[#allocation2] sm:$0xff] }
 0x2b9   : > { %1719 = vmatmul.mubr.bf16.vlgmr.msra.gmra.mrb[20].mxu0 %v1232_v30  ;;  %v1201_v1 = vsel %vm726_vm1, %v3909_v48, %v2850_v31 }
 0x2ba   : > { %2614 = vmatpush3.bf16.msra.mxu0 %v3894_v42  ;;  %1726 = vmatprep.mubr.bf16.mxu0 %v1238_v62  ;;  %v1182_v53 = vsel %vm726_vm1, %v796_v26, %v2839_v27  ;;  %v1183_v54 = vsel %vm726_vm1, %v797_v40, %v2840_v29  ;;  %v1218_v30 = vsel %vm726_vm1, %v4041_v7, %v2854_v23  ;;  %v765_v62 = vld [vmem:[#allocation2 + $0x8] sm:$0xff] }
 0x2bb   : > { %v2858_v3 = vpop.permute.xlu1 %2857  ;;  %v2843_v35 = vpop.permute.xlu0 %2842  ;;  %v1231_v14 = vpack.c.bf16 %v1183_v54, %v1182_v53  ;;  %2615 = vmatprep.subr.bf16.mxu0 %v4131_v60  ;;  %v1219_v29 = vsel %vm726_vm1, %v4047_v15, %v2855_v28  ;;  %v1237_v48 = vpack.c.bf16 %v1201_v1, %v1200_v18 }
 0x2bc   : > { %v2845_v50 = vunpack.i.h.bf16 %v2843_v35  ;;  %v2844_v39 = vunpack.i.l.bf16 %v2843_v35  ;;  %v2860_v31 = vunpack.i.h.bf16 %v2858_v3  ;;  %v2859_v27 = vunpack.i.l.bf16 %v2858_v3 }
 0x2bd   : > { %1621 = vmatprep.mubr.bf16.mxu1 %v1231_v14  ;;  %v1243_v54 = vpack.c.bf16 %v1219_v29, %v1218_v30 }
 0x2be   : > { %v1166_v47 = vsel %vm726_vm1, %v764_v37, %v2844_v39  ;;  %v1167_v0 = vsel %vm726_vm1, %v765_v62, %v2845_v50  ;;  %2616 = vmatpush3.bf16.msra.mxu0 %v4131_v60  ;;  %v1202_v30 = vsel %vm726_vm1, %v3897_v44, %v2859_v27  ;;  %v1203_v29 = vsel %vm726_vm1, %v3899_v45, %v2860_v31 }
 0x2bf   : > { %v2868_v26 = vpop.permute.xlu1 %2867  ;;  %v2863_v40 = vpop.permute.xlu0 %2862  ;;  %v1230_v53 = vpack.c.bf16 %v1167_v0, %v1166_v47  ;;  %2617 = vmatprep.subr.bf16.mxu0 %v4141_v19  ;;  %v1242_v62 = vpack.c.bf16 %v1203_v29, %v1202_v30 }
 0x2c0   : > { %v2870_v23 = vunpack.i.h.bf16 %v2868_v26  ;;  %v2869_v28 = vunpack.i.l.bf16 %v2868_v26  ;;  %v2865_v35 = vunpack.i.h.bf16 %v2863_v40  ;;  %v2864_v14 = vunpack.i.l.bf16 %v2863_v40 }
 0x2c1   : > { %1622 = vmatmul.mubr.bf16.vlgmr.msra.gmra.mrb[0].mxu1 %v1230_v53  ;;  %1727 = vmatmul.mubr.bf16.gmra.mrb[24].mxu0 %v1237_v48 }
 0x2c2   : > { %1734 = vmatprep.mubr.bf16.mxu0 %v1243_v54  ;;  %v1184_v18 = vsel %vm726_vm1, %v3911_v49, %v2864_v14  ;;  %v1185_v3 = vsel %vm726_vm1, %v3925_v55, %v2865_v35  ;;  %2665 = vmatpush3.bf16.msra.mxu1 %v3894_v42  ;;  %v1220_v55 = vsel %vm726_vm1, %v4068_v24, %v2869_v28 }
 0x2c3   : > { %v2888_v1 = vpop.permute.xlu1 %2887  ;;  %v2873_v50 = vpop.permute.xlu0 %2872  ;;  %v1236_v39 = vpack.c.bf16 %v1185_v3, %v1184_v18  ;;  %2662 = vmatprep.subr.bf16.mxu1 %v4131_v60  ;;  %2618 = vmatpush3.bf16.msra.mxu0 %v4141_v19  ;;  %v1221_v42 = vsel %vm726_vm1, %v4070_v25, %v2870_v23 }
 0x2c4   : > { %v2875_v37 = vunpack.i.h.bf16 %v2873_v50  ;;  %v2874_v49 = vunpack.i.l.bf16 %v2873_v50  ;;  %2619 = vmatprep.subr.bf16.mxu0 %v3024_v22  ;;  %v2890_v47 = vunpack.i.h.bf16 %v2888_v1  ;;  %v2889_v0 = vunpack.i.l.bf16 %v2888_v1 }
 0x2c5   : > { %1629 = vmatprep.mubr.bf16.mxu1 %v1236_v39  ;;  %v1248_v26 = vpack.c.bf16 %v1221_v42, %v1220_v55 }
 0x2c6   : > { %v1168_v44 = vsel %vm726_vm1, %v3951_v11, %v2874_v49  ;;  %v1169_v45 = vsel %vm726_vm1, %v3943_v8, %v2875_v37  ;;  %2666 = vmatpush3.bf16.msra.mxu1 %v4131_v60  ;;  %v1204_v14 = vsel %vm726_vm1, %v3945_v9, %v2889_v0  ;;  %v1205_v18 = vsel %vm726_vm1, %v3953_v12, %v2890_v47 }
 0x2c7   : > { %v2893_v48 = vpop.permute.xlu1 %2892  ;;  %v2878_v31 = vpop.permute.xlu0 %2877  ;;  %v1235_v27 = vpack.c.bf16 %v1169_v45, %v1168_v44  ;;  %2663 = vmatprep.subr.bf16.mxu1 %v4141_v19  ;;  %2620 = vmatpush3.bf16.msra.mxu0 %v3024_v22  ;;  %v1247_v39 = vpack.c.bf16 %v1205_v18, %v1204_v14 }
 0x2c8   : > { %v2895_v40 = vunpack.i.h.bf16 %v2893_v48  ;;  %v2894_v53 = vunpack.i.l.bf16 %v2893_v48  ;;  %v2880_v54 = vunpack.i.h.bf16 %v2878_v31  ;;  %v2879_v23 = vunpack.i.l.bf16 %v2878_v31 }
 0x2c9   : > { %1630 = vmatmul.mubr.bf16.gmra.mrb[4].mxu1 %v1235_v27  ;;  %1735 = vmatmul.mubr.bf16.gmra.mrb[28].mxu0 %v1242_v62 }
 0x2ca   : > { %1742 = vmatprep.mubr.bf16.mxu0 %v1248_v26  ;;  %v1186_v8 = vsel %vm726_vm1, %v3919_v51, %v2879_v23  ;;  %v1187_v11 = vsel %vm726_vm1, %v3921_v52, %v2880_v54  ;;  %2667 = vmatpush3.bf16.msra.mxu1 %v4141_v19  ;;  %v1222_v50 = vsel %vm726_vm1, %v4087_v46, %v2894_v53 }
 0x2cb   : > { %v2898_v60 = vpop.permute.xlu1 %2897  ;;  %v2883_v28 = vpop.permute.xlu0 %2882  ;;  %v1241_v35 = vpack.c.bf16 %v1187_v11, %v1186_v8  ;;  %v1223_v51 = vsel %vm726_vm1, %v4089_v36, %v2895_v40  ;;  %2664 = vmatprep.subr.bf16.mxu1 %v3024_v22 }
 0x2cc   : > { %v2885_v3 = vunpack.i.h.bf16 %v2883_v28  ;;  %v2884_v1 = vunpack.i.l.bf16 %v2883_v28  ;;  %v2900_v12 = vunpack.i.h.bf16 %v2898_v60  ;;  %v2899_v30 = vunpack.i.l.bf16 %v2898_v60 }
 0x2cd   : > { %1637 = vmatprep.mubr.bf16.mxu1 %v1241_v35  ;;  %v1253_v49 = vpack.c.bf16 %v1223_v51, %v1222_v50 }
 0x2ce   : > { %v1170_v52 = vsel %vm726_vm1, %v3986_v38, %v2884_v1  ;;  %v1171_v9 = vsel %vm726_vm1, %v3980_v34, %v2885_v3  ;;  %2668 = vmatpush3.bf16.msra.mxu1 %v3024_v22  ;;  %v1206_v48 = vsel %vm726_vm1, %v3976_v32, %v2899_v30  ;;  %v1207_v22 = vsel %vm726_vm1, %v3978_v33, %v2900_v12 }
 0x2cf   : > { %v2908_v19 = vpop.permute.xlu1 %2907  ;;  %v2903_v29 = vpop.permute.xlu0 %2902  ;;  %v1240_v37 = vpack.c.bf16 %v1171_v9, %v1170_v52  ;;  %v1252_v53 = vpack.c.bf16 %v1207_v22, %v1206_v48 }
 0x2d0   : > { %v2910_v55 = vunpack.i.h.bf16 %v2908_v19  ;;  %v2909_v42 = vunpack.i.l.bf16 %v2908_v19  ;;  %v2905_v44 = vunpack.i.h.bf16 %v2903_v29  ;;  %v2904_v45 = vunpack.i.l.bf16 %v2903_v29 }
 0x2d1   : > { %1638 = vmatmul.mubr.bf16.gmra.mrb[8].mxu1 %v1240_v37  ;;  %1743 = vmatmul.mubr.bf16.gmra.mrb[32].mxu0 %v1247_v39 }
 0x2d2   : > { %1750 = vmatprep.mubr.bf16.mxu0 %v1253_v49  ;;  %v1188_v38 = vsel %vm726_vm1, %v3963_v16, %v2904_v45  ;;  %v1189_v34 = vsel %vm726_vm1, %v3965_v17, %v2905_v44  ;;  %v1224_v26 = vsel %vm726_vm1, %v4100_v58, %v2909_v42  ;;  %v1225_v16 = vsel %vm726_vm1, %v4102_v59, %v2910_v55 }
 0x2d3   : > { %v2928_v62 = vpop.permute.xlu1 %2927  ;;  %v2913_v47 = vpop.permute.xlu0 %2912  ;;  %v1246_v0 = vpack.c.bf16 %v1189_v34, %v1188_v38  ;;  %v1258_v11 = vpack.c.bf16 %v1225_v16, %v1224_v26 }
 0x2d4   : > { %v2915_v31 = vunpack.i.h.bf16 %v2913_v47  ;;  %v2914_v27 = vunpack.i.l.bf16 %v2913_v47  ;;  %v2930_v32 = vunpack.i.h.bf16 %v2928_v62  ;;  %v2929_v54 = vunpack.i.l.bf16 %v2928_v62  ;;  %v876_v47 = vld [vmem:[#allocation2 + $0xd8] sm:$0xff] }
 0x2d5   : > { %1645 = vmatprep.mubr.bf16.mxu1 %v1246_v0  ;;  %v877_v0 = vld [vmem:[#allocation2 + $0xe0] sm:$0xff] }
 0x2d6   : > { %v1172_v17 = vsel %vm726_vm1, %v4023_v63, %v2914_v27  ;;  %v1173_v40 = vsel %vm726_vm1, %v4017_v61, %v2915_v31  ;;  %v1208_v50 = vsel %vm726_vm1, %v4009_v56, %v2929_v54  ;;  %v1209_v51 = vsel %vm726_vm1, %v4011_v57, %v2930_v32 }
 0x2d7   : > { %v2933_v23 = vpop.permute.xlu1 %2932  ;;  %v2918_v33 = vpop.permute.xlu0 %2917  ;;  %v1245_v8 = vpack.c.bf16 %v1173_v40, %v1172_v17  ;;  %v1257_v30 = vpack.c.bf16 %v1209_v51, %v1208_v50  ;;  %v894_v50 = vld [vmem:[#allocation2 + $0x32] sm:$0xff]  ;;  %v895_v51 = vld [vmem:[#allocation2 + $0x3a] sm:$0xff] }
 0x2d8   : > { %v2935_v60 = vunpack.i.h.bf16 %v2933_v23  ;;  %v2934_v28 = vunpack.i.l.bf16 %v2933_v23  ;;  %v2920_v35 = vunpack.i.h.bf16 %v2918_v33  ;;  %v2919_v14 = vunpack.i.l.bf16 %v2918_v33 }
 0x2d9   : > { %1646 = vmatmul.mubr.bf16.gmra.mrb[12].mxu1 %v1245_v8  ;;  %1751 = vmatmul.mubr.bf16.gmra.mrb[36].mxu0 %v1252_v53 }
 0x2da   : > { %1758 = vmatprep.mubr.bf16.mxu0 %v1258_v11  ;;  %v1190_v63 = vsel %vm726_vm1, %v3997_v41, %v2919_v14  ;;  %v1191_v61 = vsel %vm726_vm1, %v3999_v43, %v2920_v35  ;;  %v1226_v39 = vsel %vm726_vm1, %v4109_v2, %v2934_v28  ;;  %v1227_v41 = vsel %vm726_vm1, %v4111_v6, %v2935_v60  ;;  %v4515_v60 = vld [vmem:[#allocation31_spill] sm:$0xff]  ;;  %v4516_v35 = vld [vmem:[#allocation32_spill] sm:$0xff] }
 0x2db   : > { %v2938_v18 = vpop.permute.xlu1 %2937  ;;  %v2923_v3 = vpop.permute.xlu0 %2922  ;;  %v1251_v1 = vpack.c.bf16 %v1191_v61, %v1190_v63  ;;  %v1263_v49 = vpack.c.bf16 %v1227_v41, %v1226_v39  ;;  %v4518_v39 = vld [vmem:[#allocation34_spill] sm:$0xff] }
 0x2dc   : > { %v2925_v52 = vunpack.i.h.bf16 %v2923_v3  ;;  %v2924_v9 = vunpack.i.l.bf16 %v2923_v3  ;;  %v2940_v56 = vunpack.i.h.bf16 %v2938_v18  ;;  %v2939_v19 = vunpack.i.l.bf16 %v2938_v18 }
 0x2dd   : > { %1653 = vmatprep.mubr.bf16.mxu1 %v1251_v1 }
 0x2de   : > { %v1174_v43 = vsel %vm726_vm1, %v4041_v7, %v2924_v9  ;;  %v1175_v12 = vsel %vm726_vm1, %v4047_v15, %v2925_v52  ;;  %v1210_v34 = vsel %vm726_vm1, %v4043_v10, %v2939_v19  ;;  %v1211_v62 = vsel %vm726_vm1, %v4045_v13, %v2940_v56  ;;  %v4517_v52 = vld [vmem:[#allocation33_spill] sm:$0xff] }
 0x2df   : > { %v2953_v29 = vpop.permute.xlu1 %2952  ;;  %v2943_v57 = vpop.permute.xlu0 %2942  ;;  %v1250_v37 = vpack.c.bf16 %v1175_v12, %v1174_v43  ;;  %v1262_v26 = vpack.c.bf16 %v1211_v62, %v1210_v34  ;;  %v909_v34 = vld [vmem:[#allocation2 + $0xe2] sm:$0xff] }
 0x2e0   : > { %v2955_v55 = vunpack.i.h.bf16 %v2953_v29  ;;  %v2954_v42 = vunpack.i.l.bf16 %v2953_v29  ;;  %v2945_v2 = vunpack.i.h.bf16 %v2943_v57  ;;  %v2944_v44 = vunpack.i.l.bf16 %v2943_v57  ;;  %v896_v57 = vld [vmem:[#allocation2 + $0x4a] sm:$0xff] }
 0x2e1   : > { %1654 = vmatmul.mubr.bf16.gmra.mrb[16].mxu1 %v1250_v37  ;;  %1759 = vmatmul.mubr.bf16.gmra.mrb[40].mxu0 %v1257_v30  ;;  %v1234_v29 = vpack.c.bf16 %v895_v51, %v894_v50  ;;  %v897_v37 = vld [vmem:[#allocation2 + $0x52] sm:$0xff] }
 0x2e2   : > { %1766 = vmatprep.mubr.bf16.mxu0 %v1263_v49  ;;  %v1192_v7 = vsel %vm726_vm1, %v4033_v4, %v2944_v44  ;;  %v1193_v15 = vsel %vm726_vm1, %v4035_v5, %v2945_v2  ;;  %v1228_v31 = vsel %vm726_vm1, %v876_v47, %v2954_v42  ;;  %v1229_v4 = vsel %vm726_vm1, %v877_v0, %v2955_v55  ;;  %v898_v49 = vld [vmem:[#allocation2 + $0x62] sm:$0xff]  ;;  %v899_v55 = vld [vmem:[#allocation2 + $0x6a] sm:$0xff]  ;;  %v3025_v47 = vld [vmem:[#allocation14] sm:$0xff]  }
 0x2e3   : > { %v2958_v6 = vpop.permute.xlu1 %2957  ;;  %v2948_v45 = vpop.permute.xlu0 %2947  ;;  %v1256_v38 = vpack.c.bf16 %v1193_v15, %v1192_v7  ;;  %v1268_v53 = vpack.c.bf16 %v1229_v4, %v1228_v31  ;;  %v1239_v2 = vpack.c.bf16 %v897_v37, %v896_v57  ;;  %v1244_v44 = vpack.c.bf16 %v899_v55, %v898_v49  ;;  %v901_v15 = vld [vmem:[#allocation2 + $0x82] sm:$0xff]  ;;  %2637 = vmatprep.subr.bf16.mxu1 %v3025_v47 }
 0x2e4   : > { %v2950_v48 = vunpack.i.h.bf16 %v2948_v45  ;;  %v2949_v22 = vunpack.i.l.bf16 %v2948_v45  ;;  %v2960_v10 = vunpack.i.h.bf16 %v2958_v6  ;;  %v2959_v16 = vunpack.i.l.bf16 %v2958_v6  ;;  %v4519_v45 = vld [vmem:[#allocation30_spill] sm:$0xff] }
 0x2e5   : > { %1661 = vmatprep.mubr.bf16.mxu1 %v1256_v38  ;;  %v1254_v7 = vpack.c.bf16 %v4058_v21, %v4056_v20  ;;  %v1259_v6 = vpack.c.bf16 %v4518_v39, %v4517_v52  ;;  %v4520_v38 = vld [vmem:[#allocation29_spill] sm:$0xff] }
 0x2e6   : > { %v1176_v5 = vsel %vm726_vm1, %v4068_v24, %v2949_v22  ;;  %v1177_v27 = vsel %vm726_vm1, %v4070_v25, %v2950_v48  ;;  %v1212_v28 = vsel %vm726_vm1, %v4515_v60, %v2959_v16  ;;  %v1213_v14 = vsel %vm726_vm1, %v4516_v35, %v2960_v10  ;;  %v3026_v0 = vld [vmem:[#allocation14 + $0x8] sm:$0xff]   ;;  %v3027_v48 = vld [vmem:[#allocation14 + $0x10] sm:$0xff]   ;;  %v3028_v22 = vld [vmem:[#allocation14 + $0x18] sm:$0xff]  }
 0x2e7   : > { %v2968_v17 = vpop.permute.xlu1 %2967  ;;  %v2963_v13 = vpop.permute.xlu0 %2962  ;;  %v1255_v40 = vpack.c.bf16 %v1177_v27, %v1176_v5  ;;  %v1267_v12 = vpack.c.bf16 %v1213_v14, %v1212_v28 }
 0x2e8   : > { %v2970_v32 = vunpack.i.h.bf16 %v2968_v17  ;;  %v2969_v54 = vunpack.i.l.bf16 %v2968_v17  ;;  %v2965_v23 = vunpack.i.h.bf16 %v2963_v13  ;;  %v2964_v33 = vunpack.i.l.bf16 %v2963_v13  ;;  %v4270_v13 = vld [vmem:[#allocation12] ss:$0 sm:$0xff] }
 0x2e9   : > { %1662 = vmatmul.mubr.bf16.gmra.mrb[20].mxu1 %v1255_v40  ;;  %1767 = vmatmul.mubr.bf16.gmra.mrb[44].mxu0 %v1262_v26 }
 0x2ea   : > { %1774 = vmatprep.mubr.bf16.mxu0 %v1268_v53  ;;  %v1194_v24 = vsel %vm726_vm1, %v4056_v20, %v2964_v33  ;;  %v1195_v25 = vsel %vm726_vm1, %v4058_v21, %v2965_v23  ;;  %v1178_v18 = vsel %vm726_vm1, %v4087_v46, %v2969_v54  ;;  %v1179_v3 = vsel %vm726_vm1, %v4089_v36, %v2970_v32  ;;  %v908_v21 = vld [vmem:[#allocation2 + $0xda] sm:$0xff] }
 0x2eb   : > { %v2973_v8 = vpop.permute.xlu0 %2972  ;;  %v1261_v11 = vpack.c.bf16 %v1195_v25, %v1194_v24  ;;  %v2978_v1 = vpop.permute.xlu1 %2977  ;;  %v1260_v43 = vpack.c.bf16 %v1179_v3, %v1178_v18  ;;  %v4521_v20 = vpack.c.bf16 %v4519_v45, %v4520_v38  ;;  %v1269_v62 = vpack.c.bf16 %v909_v34, %v908_v21 }
 0x2ec   : > { %v2975_v63 = vunpack.i.h.bf16 %v2973_v8  ;;  %v2974_v61 = vunpack.i.l.bf16 %v2973_v8  ;;  %v2980_v56 = vunpack.i.h.bf16 %v2978_v1  ;;  %v2979_v19 = vunpack.i.l.bf16 %v2978_v1 }
 0x2ed   : > { %1669 = vmatprep.mubr.bf16.mxu1 %v1261_v11 }
 0x2ee   : > { %v1196_v9 = vsel %vm726_vm1, %v4517_v52, %v2974_v61  ;;  %v1197_v41 = vsel %vm726_vm1, %v4518_v39, %v2975_v63  ;;  %v1180_v46 = vsel %vm726_vm1, %v4100_v58, %v2979_v19  ;;  %v1181_v36 = vsel %vm726_vm1, %v4102_v59, %v2980_v56  ;;  %v900_v58 = vld [vmem:[#allocation2 + $0x7a] sm:$0xff] }
 0x2ef   : > { %v1266_v30 = vpack.c.bf16 %v1197_v41, %v1196_v9  ;;  %v1265_v42 = vpack.c.bf16 %v1181_v36, %v1180_v46  ;;  %v1249_v59 = vpack.c.bf16 %v901_v15, %v900_v58 }
 0x2f1   : > { %1670 = vmatmul.mubr.bf16.gmra.mrb[24].mxu1 %v1260_v43  ;;  %1775 = vmatmul.mubr.bf16.gmra.mrb[48].mxu0 %v1267_v12 }
 0x2f2   : > { %1677 = vmatprep.mubr.bf16.mxu1 %v1266_v30  ;;  %2621 = vmatprep.mubr.msk.bf16.mxu0 %vm726_vm1, %v1234_v29 }
 0x2f9   : > { %1678 = vmatmul.mubr.bf16.gmra.mrb[28].mxu1 %v1265_v42  ;;  %2622 = vmatmul.mubr.msk.bf16.vlgmr.msra.gmra.mrb[52].mxu0 %vm726_vm1, %v1239_v2 }
 0x2fa   : > { %2625 = vmatprep.mubr.msk.bf16.mxu0 %vm726_vm1, %v1244_v44  ;;  %2629 = vmatprep.mubr.msk.bf16.mxu1 %vm726_vm1, %v1254_v7 }
 0x301   : > { %2626 = vmatmul.mubr.msk.bf16.gmra.mrb[56].mxu0 %vm726_vm1, %v1249_v59  ;;  %2630 = vmatmul.mubr.msk.bf16.vlgmr.msra.gmra.mrb[32].mxu1 %vm726_vm1, %v1259_v6 }
 0x302   : > { %2633 = vmatprep.mubr.msk.bf16.mxu1 %vm726_vm1, %v4521_v20  ;;  %2638 = vmatpush3.bf16.msra.mxu1 %v3025_v47 }
 0x303   : > { %2639 = vmatprep.subr.bf16.mxu1 %v3026_v0 }
 0x306   : > { %2640 = vmatpush3.bf16.msra.mxu1 %v3026_v0 }
 0x307   : > { %2641 = vmatprep.subr.bf16.mxu1 %v3027_v48 }
 0x309   : > { %2634 = vmatmul.mubr.msk.bf16.gmra.mrb[36].mxu1 %vm726_vm1, %v1269_v62 }
 0x30a   : > { %2642 = vmatpush3.bf16.msra.mxu1 %v3027_v48 }
 0x30b   : > { %2643 = vmatprep.subr.bf16.mxu1 %v3028_v22 }
 0x30e   : > { %2644 = vmatpush3.bf16.msra.mxu1 %v3028_v22 }
 0x38c   : > { %v2505_v31 = vpop.f32.mrb[20].mxu0 }
 0x38d   : > { %v2506_v4 = vpop.f32.mrb[21].mxu0 }
 0x38e   : > { %v2507_v5 = vadd.f32 %v2506_v4, %v2505_v31  ;;  %v2508_v27 = vpop.f32.mrb[22].mxu0 }
 0x38f   : > { %v2509_v26 = vpop.f32.mrb[23].mxu0 }
 0x390   : > { %v2510_v10 = vadd.f32 %v2509_v26, %v2508_v27 }
 0x394   : > { %v2441_v16 = vpop.f32.mrb[0].mxu1  ;;  %v2511_v17 = vpop.f32.mrb[24].mxu0 }
 0x395   : > { %v2442_v40 = vpop.f32.mrb[1].mxu1  ;;  %v2512_v53 = vpop.f32.mrb[25].mxu0 }
 0x396   : > { %v2443_v32 = vadd.f32 %v2442_v40, %v2441_v16  ;;  %v2513_v54 = vadd.f32 %v2512_v53, %v2511_v17  ;;  %v2444_v23 = vpop.f32.mrb[2].mxu1  ;;  %v2514_v33 = vpop.f32.mrb[26].mxu0 }
 0x397   : > { %v2445_v24 = vpop.f32.mrb[3].mxu1  ;;  %v2515_v25 = vpop.f32.mrb[27].mxu0 }
 0x398   : > { %v1624_v8 = vadd.f32 %v2443_v32, %v4270_v13  ;;  %v2446_v11 = vadd.f32 %v2445_v24, %v2444_v23  ;;  %v2516_v60 = vadd.f32 %v2515_v25, %v2514_v33 }
 0x39a   : > { %v1627_v28 = vadd.f32 %v2446_v11, %v4270_v13  ;;  %v4274_v35 = vadd.f32 %v2507_v5, %v1624_v8 }
 0x39c   : > { %v2447_v14 = vpop.f32.mrb[4].mxu1  ;;  %v2517_v63 = vpop.f32.mrb[28].mxu0  ;;  %v4276_v61 = vadd.f32 %v2510_v10, %v1627_v28 }
 0x39d   : > { %v2448_v18 = vpop.f32.mrb[5].mxu1  ;;  %v2518_v3 = vpop.f32.mrb[29].mxu0 }
 0x39e   : > { %v2449_v1 = vadd.f32 %v2448_v18, %v2447_v14  ;;  %v2519_v50 = vadd.f32 %v2518_v3, %v2517_v63  ;;  %v2450_v51 = vpop.f32.mrb[6].mxu1  ;;  %v2520_v52 = vpop.f32.mrb[30].mxu0 }
 0x39f   : > { %v2451_v9 = vpop.f32.mrb[7].mxu1  ;;  %v2521_v39 = vpop.f32.mrb[31].mxu0 }
 0x3a0   : > { %v1632_v41 = vadd.f32 %v2449_v1, %v4270_v13  ;;  %v2452_v43 = vadd.f32 %v2451_v9, %v2450_v51  ;;  %v2522_v12 = vadd.f32 %v2521_v39, %v2520_v52 }
 0x3a2   : > { %v1635_v30 = vadd.f32 %v2452_v43, %v4270_v13  ;;  %v4280_v56 = vadd.f32 %v2513_v54, %v1632_v41 }
 0x3a4   : > { %v2453_v19 = vpop.f32.mrb[8].mxu1  ;;  %v2523_v29 = vpop.f32.mrb[32].mxu0  ;;  %v4282_v46 = vadd.f32 %v2516_v60, %v1635_v30 }
 0x3a5   : > { %v2454_v36 = vpop.f32.mrb[9].mxu1  ;;  %v2524_v57 = vpop.f32.mrb[33].mxu0 }
 0x3a6   : > { %v2455_v37 = vadd.f32 %v2454_v36, %v2453_v19  ;;  %v2525_v49 = vadd.f32 %v2524_v57, %v2523_v29  ;;  %v2456_v55 = vpop.f32.mrb[10].mxu1  ;;  %v2526_v42 = vpop.f32.mrb[34].mxu0 }
 0x3a7   : > { %v2457_v2 = vpop.f32.mrb[11].mxu1  ;;  %v2527_v44 = vpop.f32.mrb[35].mxu0 }
 0x3a8   : > { %v1640_v7 = vadd.f32 %v2455_v37, %v4270_v13  ;;  %v2458_v58 = vadd.f32 %v2457_v2, %v2456_v55  ;;  %v2528_v15 = vadd.f32 %v2527_v44, %v2526_v42 }
 0x3aa   : > { %v1643_v59 = vadd.f32 %v2458_v58, %v4270_v13  ;;  %v4286_v6 = vadd.f32 %v2519_v50, %v1640_v7 }
 0x3ac   : > { %v2459_v45 = vpop.f32.mrb[12].mxu1  ;;  %v2529_v38 = vpop.f32.mrb[36].mxu0  ;;  %v4288_v20 = vadd.f32 %v2522_v12, %v1643_v59 }
 0x3ad   : > { %v2460_v21 = vpop.f32.mrb[13].mxu1  ;;  %v2530_v34 = vpop.f32.mrb[37].mxu0 }
 0x3ae   : > { %v2461_v62 = vadd.f32 %v2460_v21, %v2459_v45  ;;  %v2531_v47 = vadd.f32 %v2530_v34, %v2529_v38  ;;  %v2462_v0 = vpop.f32.mrb[14].mxu1  ;;  %v2532_v48 = vpop.f32.mrb[38].mxu0 }
 0x3af   : > { %v2463_v22 = vpop.f32.mrb[15].mxu1  ;;  %v2533_v31 = vpop.f32.mrb[39].mxu0 }
 0x3b0   : > { %v1648_v4 = vadd.f32 %v2461_v62, %v4270_v13  ;;  %v2464_v5 = vadd.f32 %v2463_v22, %v2462_v0  ;;  %v2534_v27 = vadd.f32 %v2533_v31, %v2532_v48 }
 0x3b2   : > { %v1651_v26 = vadd.f32 %v2464_v5, %v4270_v13  ;;  %v4292_v10 = vadd.f32 %v2525_v49, %v1648_v4 }
 0x3b4   : > { %v2465_v16 = vpop.f32.mrb[16].mxu1  ;;  %v2535_v17 = vpop.f32.mrb[40].mxu0  ;;  %v4294_v40 = vadd.f32 %v2528_v15, %v1651_v26 }
 0x3b5   : > { %v2466_v53 = vpop.f32.mrb[17].mxu1  ;;  %v2536_v32 = vpop.f32.mrb[41].mxu0 }
 0x3b6   : > { %v2467_v54 = vadd.f32 %v2466_v53, %v2465_v16  ;;  %v2537_v23 = vadd.f32 %v2536_v32, %v2535_v17  ;;  %v2468_v33 = vpop.f32.mrb[18].mxu1  ;;  %v2538_v24 = vpop.f32.mrb[42].mxu0 }
 0x3b7   : > { %v2469_v25 = vpop.f32.mrb[19].mxu1  ;;  %v2539_v8 = vpop.f32.mrb[43].mxu0 }
 0x3b8   : > { %v1656_v11 = vadd.f32 %v2467_v54, %v4270_v13  ;;  %v2470_v60 = vadd.f32 %v2469_v25, %v2468_v33  ;;  %v2540_v28 = vadd.f32 %v2539_v8, %v2538_v24 }
 0x3ba   : > { %v1659_v14 = vadd.f32 %v2470_v60, %v4270_v13  ;;  %v4298_v63 = vadd.f32 %v2531_v47, %v1656_v11 }
 0x3bc   : > { %v2471_v18 = vpop.f32.mrb[20].mxu1  ;;  %v2541_v3 = vpop.f32.mrb[44].mxu0  ;;  %v4300_v1 = vadd.f32 %v2534_v27, %v1659_v14 }
 0x3bd   : > { %v2472_v50 = vpop.f32.mrb[21].mxu1  ;;  %v2542_v51 = vpop.f32.mrb[45].mxu0 }
 0x3be   : > { %v2473_v52 = vadd.f32 %v2472_v50, %v2471_v18  ;;  %v2543_v9 = vadd.f32 %v2542_v51, %v2541_v3  ;;  %v2474_v39 = vpop.f32.mrb[22].mxu1  ;;  %v2544_v41 = vpop.f32.mrb[46].mxu0 }
 0x3bf   : > { %v2475_v43 = vpop.f32.mrb[23].mxu1  ;;  %v2545_v12 = vpop.f32.mrb[47].mxu0 }
 0x3c0   : > { %v1664_v30 = vadd.f32 %v2473_v52, %v4270_v13  ;;  %v2476_v19 = vadd.f32 %v2475_v43, %v2474_v39  ;;  %v2546_v29 = vadd.f32 %v2545_v12, %v2544_v41 }
 0x3c2   : > { %v1667_v36 = vadd.f32 %v2476_v19, %v4270_v13  ;;  %v1761_v57 = vadd.f32 %v2537_v23, %v1664_v30 }
 0x3c4   : > { %v2477_v37 = vpop.f32.mrb[24].mxu1  ;;  %v2547_v49 = vpop.f32.mrb[48].mxu0  ;;  %v1764_v55 = vadd.f32 %v2540_v28, %v1667_v36 }
 0x3c5   : > { %v2478_v42 = vpop.f32.mrb[25].mxu1  ;;  %v2548_v2 = vpop.f32.mrb[49].mxu0 }
 0x3c6   : > { %v2479_v44 = vadd.f32 %v2478_v42, %v2477_v37  ;;  %v2549_v7 = vadd.f32 %v2548_v2, %v2547_v49  ;;  %v2480_v58 = vpop.f32.mrb[26].mxu1  ;;  %v2550_v15 = vpop.f32.mrb[50].mxu0 }
 0x3c7   : > { %v2481_v59 = vpop.f32.mrb[27].mxu1  ;;  %v2551_v45 = vpop.f32.mrb[51].mxu0 }
 0x3c8   : > { %v1672_v38 = vadd.f32 %v2479_v44, %v4270_v13  ;;  %v2482_v21 = vadd.f32 %v2481_v59, %v2480_v58  ;;  %v2552_v34 = vadd.f32 %v2551_v45, %v2550_v15 }
 0x3ca   : > { %v1675_v62 = vadd.f32 %v2482_v21, %v4270_v13  ;;  %v1769_v47 = vadd.f32 %v2543_v9, %v1672_v38 }
 0x3cc   : > { %v2483_v0 = vpop.f32.mrb[28].mxu1  ;;  %v2623_v48 = vpop.f32.mrb[52].mxu0  ;;  %v1772_v22 = vadd.f32 %v2546_v29, %v1675_v62 }
 0x3cd   : > { %v1826_v31 = vadd.f32 %v2623_v48, %v4280_v56  ;;  %v2484_v4 = vpop.f32.mrb[29].mxu1  ;;  %v1817_v5 = vpop.f32.mrb[53].mxu0 }
 0x3ce   : > { %v2485_v27 = vadd.f32 %v2484_v4, %v2483_v0  ;;  %v1818_v26 = vadd.f32 %v1817_v5, %v4274_v35  ;;  %v2486_v16 = vpop.f32.mrb[30].mxu1  ;;  %v2624_v17 = vpop.f32.mrb[54].mxu0 }
 0x3cf   : > { %v1829_v53 = vadd.f32 %v2624_v17, %v4282_v46  ;;  %v2487_v32 = vpop.f32.mrb[31].mxu1  ;;  %v1820_v54 = vpop.f32.mrb[55].mxu0  ;;  %v1882_v25 = vmax.f32 %v1826_v31, 0.0  ;;  %v3029_v17 = vld [vmem:[%s3798_s14 + $0x10] sm:$0xff] }
 0x3d0   : > { %v1680_v23 = vadd.f32 %v2485_v27, %v4270_v13  ;;  %v2488_v33 = vadd.f32 %v2487_v32, %v2486_v16  ;;  %v1821_v24 = vadd.f32 %v1820_v54, %v4276_v61  ;;  %v1880_v11 = vmax.f32 %v1818_v26, 0.0 }
 0x3d1   : > { %v1883_v8 = vmax.f32 %v1829_v53, 0.0 }
 0x3d2   : > { %v1683_v56 = vadd.f32 %v2488_v33, %v4270_v13  ;;  %v1881_v60 = vmax.f32 %v1821_v24, 0.0  ;;  %v1777_v28 = vadd.f32 %v2549_v7, %v1680_v23  ;;  %v3030_v23 = vld [vmem:[%s3798_s14] sm:$0xff] }
 0x3d3   : > { %v1897_v14 = vpack.c.bf16 %v1883_v8, %v1882_v25  ;;  %v3031_v8 = vld [vmem:[%s3798_s14 + $0x18] sm:$0xff] }
 0x3d4   : > { %v1896_v35 = vpack.c.bf16 %v1881_v60, %v1880_v11  ;;  %v2627_v18 = vpop.f32.mrb[56].mxu0  ;;  %v2631_v3 = vpop.f32.mrb[32].mxu1  ;;  %v1780_v50 = vadd.f32 %v2552_v34, %v1683_v56  ;;  %v3032_v60 = vld [vmem:[%s3798_s14 + $0x8] sm:$0xff] }
 0x3d5   : > { %v1842_v46 = vadd.f32 %v2627_v18, %v4292_v10  ;;  %v1858_v51 = vadd.f32 %v2631_v3, %v1761_v57  ;;  %v1833_v52 = vpop.f32.mrb[57].mxu0  ;;  %v1849_v9 = vpop.f32.mrb[33].mxu1 }
 0x3d6   : > { %v1834_v39 = vadd.f32 %v1833_v52, %v4286_v6  ;;  %v1850_v61 = vadd.f32 %v1849_v9, %v4298_v63  ;;  %v2628_v41 = vpop.f32.mrb[58].mxu0  ;;  %v2632_v43 = vpop.f32.mrb[34].mxu1  ;;  %2645 = vmatprep.mubr.msk.bf16.mxu1 %vm726_vm1, %v1896_v35  ;;  %v3033_v52 = vld [vmem:[%s3798_s14 + $0x30] sm:$0xff] }
 0x3d7   : > { %v1845_v13 = vadd.f32 %v2628_v41, %v4294_v40  ;;  %v1861_v12 = vadd.f32 %v2632_v43, %v1764_v55  ;;  %v1836_v30 = vpop.f32.mrb[59].mxu0  ;;  %v1852_v19 = vpop.f32.mrb[35].mxu1  ;;  %2646 = vmatmul.mubr.msk.bf16.vlgmr.msra.gmra.mrb[40].mxu1 %vm726_vm1, %v1897_v14  ;;  %v1886_v36 = vmax.f32 %v1842_v46, 0.0  ;;  %v1890_v57 = vmax.f32 %v1858_v51, 0.0  ;;  %v3034_v41 = vld [vmem:[%s3798_s14 + $0x20] sm:$0xff] }
 0x3d8   : > { %v1837_v10 = vadd.f32 %v1836_v30, %v4288_v20  ;;  %v1853_v29 = vadd.f32 %v1852_v19, %v4300_v1  ;;  %v1884_v63 = vmax.f32 %v1834_v39, 0.0  ;;  %v1888_v49 = vmax.f32 %v1850_v61, 0.0  ;;  %v3035_v30 = vld [vmem:[%s3798_s14 + $0x38] sm:$0xff] }
 0x3d9   : > { %v1887_v6 = vmax.f32 %v1845_v13, 0.0  ;;  %v1891_v37 = vmax.f32 %v1861_v12, 0.0 }
 0x3da   : > { %v1885_v42 = vmax.f32 %v1837_v10, 0.0  ;;  %v1889_v2 = vmax.f32 %v1853_v29, 0.0  ;;  %v3036_v29 = vld [vmem:[%s3798_s14 + $0x28] sm:$0xff] }
 0x3db   : > { %v1899_v44 = vpack.c.bf16 %v1887_v6, %v1886_v36  ;;  %v1901_v7 = vpack.c.bf16 %v1891_v37, %v1890_v57 }
 0x3dc   : > { %v1898_v40 = vpack.c.bf16 %v1885_v42, %v1884_v63  ;;  %v1900_v55 = vpack.c.bf16 %v1889_v2, %v1888_v49  ;;  %v2635_v58 = vpop.f32.mrb[36].mxu1 }
 0x3dd   : > { %v1874_v15 = vadd.f32 %v2635_v58, %v1777_v28  ;;  %v1865_v59 = vpop.f32.mrb[37].mxu1  ;;  %v3038_v58 = vld [vmem:[%s3798_s14 + $0x40] sm:$0xff] }
 0x3de   : > { %v1866_v45 = vadd.f32 %v1865_v59, %v1769_v47  ;;  %v2636_v38 = vpop.f32.mrb[38].mxu1  ;;  %2649 = vmatprep.mubr.msk.bf16.mxu1 %vm726_vm1, %v1898_v40  ;;  %v4326_v47 = vld [vmem:[#allocation15] ss:$0 sm:$0xff] }
 0x3df   : > { %v1877_v20 = vadd.f32 %v2636_v38, %v1780_v50  ;;  %v1868_v1 = vpop.f32.mrb[39].mxu1  ;;  %2650 = vmatmul.mubr.msk.bf16.gmra.mrb[44].mxu1 %vm726_vm1, %v1899_v44  ;;  %v1894_v34 = vmax.f32 %v1874_v15, 0.0  ;;  %v3037_v44 = vld [vmem:[%s3798_s14 + $0x50] sm:$0xff]  ;;  %v3039_v38 = vld [vmem:[%s3798_s14 + $0x58] sm:$0xff] }
 0x3e0   : > { %v1869_v21 = vadd.f32 %v1868_v1, %v1772_v22  ;;  %2653 = vmatprep.mubr.msk.bf16.mxu1 %vm726_vm1, %v1900_v55  ;;  %v1892_v0 = vmax.f32 %v1866_v45, 0.0 }
 0x3e1   : > { %v1895_v62 = vmax.f32 %v1877_v20, 0.0 }
 0x3e2   : > { %v1893_v48 = vmax.f32 %v1869_v21, 0.0  ;;  %v3040_v21 = vld [vmem:[%s3798_s14 + $0x48] sm:$0xff] }
 0x3e3   : > { %v1903_v31 = vpack.c.bf16 %v1895_v62, %v1894_v34 }
 0x3e4   : > { %v1902_v4 = vpack.c.bf16 %v1893_v48, %v1892_v0 }
 0x3e7   : > { %2654 = vmatmul.mubr.msk.bf16.gmra.mrb[48].mxu1 %vm726_vm1, %v1901_v7 }
 0x3e8   : > { %2657 = vmatprep.mubr.msk.bf16.mxu1 %vm726_vm1, %v1902_v4 }
 0x3ef   : > { %2658 = vmatmul.mubr.msk.bf16.gmra.mrb[52].mxu1 %vm726_vm1, %v1903_v31 }
 0x4aa   : > { %v2647_v22 = vpop.f32.mrb[40].mxu1 }
 0x4ab   : > { %v2010_v5 = vadd.f32 %v2647_v22, %v4326_v47  ;;  %v2001_v27 = vpop.f32.mrb[41].mxu1 }
 0x4ac   : > { %v2002_v26 = vadd.f32 %v4326_v47, %v2001_v27  ;;  %v2648_v16 = vpop.f32.mrb[42].mxu1  ;;  %v3041_v27 = vld [vmem:[%s3798_s14 + $0x70] sm:$0xff] }
 0x4ad   : > { %v2066_v53 = vadd.f32 %v3029_v17, %v2010_v5  ;;  %v2013_v32 = vadd.f32 %v2648_v16, %v4326_v47  ;;  %v2004_v54 = vpop.f32.mrb[43].mxu1 }
 0x4ae   : > { %v2064_v33 = vadd.f32 %v3030_v23, %v2002_v26  ;;  %v2005_v24 = vadd.f32 %v4326_v47, %v2004_v54 }
 0x4af   : > { %v2082_v25 = vmax.f32 %v2066_v53, 0.0  ;;  %v2067_v11 = vadd.f32 %v3031_v8, %v2013_v32  ;;  %v3042_v53 = vld [vmem:[%s3798_s14 + $0x60] sm:$0xff]  ;;  %v3044_v8 = vld [vmem:[%s3798_s14 + $0x68] sm:$0xff] }
 0x4b0   : > { %v2080_v56 = vmax.f32 %v2064_v33, 0.0  ;;  %v2065_v28 = vadd.f32 %v3032_v60, %v2005_v24  ;;  %v3043_v33 = vld [vmem:[%s3798_s14 + $0x78] sm:$0xff]  ;;  %s3407_s14 = smov [#allocation17]  }
 0x4b1   : > { %2098 = vst [vmem:[%s4338_s0 + $0x10] sm:$0xff] %v2082_v25  ;;  %v2083_v14 = vmax.f32 %v2067_v11, 0.0  ;;  %s3277_s3 = sshll.u32 %s3407_s14, 4  ;;  %s3278_s3 = int_to_ptr.vmem [resolvable:$false] %s3277_s3 }
 0x4b2   : > { %2096 = vst [vmem:[%s4338_s0] sm:$0xff] %v2080_v56  ;;  %v2081_v35 = vmax.f32 %v2065_v28, 0.0  ;;  %v2651_v18 = vpop.f32.mrb[44].mxu1  ;;  %s3279_s2 = scalar_lea.vmem %s3278_s3, 4096  ;;  %p3280_p7 = scmp.lt.s32.totalorder %s4380_s26, %s3278_s3 }
 0x4b3   : > { %2099 = vst [vmem:[%s4338_s0 + $0x18] sm:$0xff] %v2083_v14  ;;  %v2026_v3 = vadd.f32 %v2651_v18, %v4326_v47  ;;  %v2017_v50 = vpop.f32.mrb[45].mxu1  ;;  %p3281_p5 = scmp.lt.s32.totalorder %s3279_s2, %s3273_s22 }
 0x4b4   : > { %2097 = vst [vmem:[%s4338_s0 + $0x8] sm:$0xff] %v2081_v35  ;;  %v2018_v46 = vadd.f32 %v4326_v47, %v2017_v50  ;;  %v2652_v51 = vpop.f32.mrb[46].mxu1 }
 0x4b5   : > { %v2070_v9 = vadd.f32 %v3033_v52, %v2026_v3  ;;  %v2029_v39 = vadd.f32 %v2652_v51, %v4326_v47  ;;  %v2020_v61 = vpop.f32.mrb[47].mxu1  ;;  %p3282_p1 = por %p3281_p5, %p3280_p7 }
 0x4b6   : > { %v2068_v43 = vadd.f32 %v3034_v41, %v2018_v46  ;;  %v2021_v13 = vadd.f32 %v4326_v47, %v2020_v61 }
 0x4b7   : > { %v2086_v12 = vmax.f32 %v2070_v9, 0.0  ;;  %v2071_v19 = vadd.f32 %v3035_v30, %v2029_v39  ;;  %p3283_p11 = pnand %p3282_p1, %p3276_p3 }
 0x4b8   : > { %v2084_v10 = vmax.f32 %v2068_v43, 0.0  ;;  %v2069_v36 = vadd.f32 %v3036_v29, %v2021_v13 }
 0x4b9   : > { %2102 = vst [vmem:[%s4338_s0 + $0x30] sm:$0xff] %v2086_v12  ;;  %v2087_v57 = vmax.f32 %v2071_v19, 0.0 }
 0x4ba   : > { %2100 = vst [vmem:[%s4338_s0 + $0x20] sm:$0xff] %v2084_v10  ;;  %v2085_v6 = vmax.f32 %v2069_v36, 0.0  ;;  %v2655_v37 = vpop.f32.mrb[48].mxu1 }
 0x4bb   : > { %2103 = vst [vmem:[%s4338_s0 + $0x38] sm:$0xff] %v2087_v57  ;;  %v2042_v63 = vadd.f32 %v2655_v37, %v4326_v47  ;;  %v2033_v49 = vpop.f32.mrb[49].mxu1 }
 0x4bc   : > { %2101 = vst [vmem:[%s4338_s0 + $0x28] sm:$0xff] %v2085_v6  ;;  %v2034_v42 = vadd.f32 %v4326_v47, %v2033_v49  ;;  %v2656_v2 = vpop.f32.mrb[50].mxu1 }
 0x4bd   : > { %v2074_v7 = vadd.f32 %v3037_v44, %v2042_v63  ;;  %v2045_v40 = vadd.f32 %v2656_v2, %v4326_v47  ;;  %v2036_v55 = vpop.f32.mrb[51].mxu1 }
 0x4be   : > { %v2072_v15 = vadd.f32 %v3038_v58, %v2034_v42  ;;  %v2037_v59 = vadd.f32 %v4326_v47, %v2036_v55 }
 0x4bf   : > { %v2090_v45 = vmax.f32 %v2074_v7, 0.0  ;;  %v2075_v20 = vadd.f32 %v3039_v38, %v2045_v40 }
 0x4c0   : > { %v2088_v1 = vmax.f32 %v2072_v15, 0.0  ;;  %v2073_v34 = vadd.f32 %v3040_v21, %v2037_v59 }
 0x4c1   : > { %2106 = vst [vmem:[%s4338_s0 + $0x50] sm:$0xff] %v2090_v45  ;;  %v2091_v62 = vmax.f32 %v2075_v20, 0.0 }
 0x4c2   : > { %2104 = vst [vmem:[%s4338_s0 + $0x40] sm:$0xff] %v2088_v1  ;;  %v2089_v0 = vmax.f32 %v2073_v34, 0.0  ;;  %v2659_v48 = vpop.f32.mrb[52].mxu1 }
 0x4c3   : > { %2107 = vst [vmem:[%s4338_s0 + $0x58] sm:$0xff] %v2091_v62  ;;  %v2058_v31 = vadd.f32 %v2659_v48, %v4326_v47  ;;  %v2049_v4 = vpop.f32.mrb[53].mxu1 }
 0x4c4   : > { %2105 = vst [vmem:[%s4338_s0 + $0x48] sm:$0xff] %v2089_v0  ;;  %v2050_v22 = vadd.f32 %v4326_v47, %v2049_v4  ;;  %v2660_v5 = vpop.f32.mrb[54].mxu1 }
 0x4c5   : > { %v2078_v26 = vadd.f32 %v3041_v27, %v2058_v31  ;;  %v2061_v16 = vadd.f32 %v2660_v5, %v4326_v47  ;;  %v2052_v17 = vpop.f32.mrb[55].mxu1 }
 0x4c6   : > { %v2076_v32 = vadd.f32 %v3042_v53, %v2050_v22  ;;  %v2053_v54 = vadd.f32 %v4326_v47, %v2052_v17 }
 0x4c7   : > { %v2094_v23 = vmax.f32 %v2078_v26, 0.0  ;;  %v2079_v24 = vadd.f32 %v3043_v33, %v2061_v16 }
 0x4c8   : > { %v2092_v25 = vmax.f32 %v2076_v32, 0.0  ;;  %v2077_v11 = vadd.f32 %v3044_v8, %v2053_v54 }
 0x4c9   : > { %2110 = vst [vmem:[%s4338_s0 + $0x70] sm:$0xff] %v2094_v23  ;;  %v2095_v56 = vmax.f32 %v2079_v24, 0.0 }
 0x4ca   : > { %2108 = vst [vmem:[%s4338_s0 + $0x60] sm:$0xff] %v2092_v25  ;;  %v2093_v47 = vmax.f32 %v2077_v11, 0.0 }
 0x4cb   : > { %2111 = vst [vmem:[%s4338_s0 + $0x78] sm:$0xff] %v2095_v56 }
 0x4cc   : > { %2109 = vst [vmem:[%s4338_s0 + $0x68] sm:$0xff] %v2093_v47 }
 0x4cd   : > { %3286 = shalt.err (!%p3283_p11)
}
 0x4ce   : > { %s3287_s24 = scalar_lea.hbm %s4386_s20, 2048  ;;  %s3291_s6 = scalar_lea.hbm %s4524_s15, 8192 }
 0x4cf   : > { %p3288_p12 = scmp.ne.s32.totalorder %s4386_s20, %s3287_s24  ;;  %p3292_p0 = scmp.lt.u32.totalorder %s4386_s20, %s4524_s15 }
 0x4d0   : > { %p3293_p4 = scmp.lt.u32.totalorder %s3291_s6, %s3287_s24  ;;  %p3295_p6 = scmp.lt.u32.totalorder %s3287_s24, %s4386_s20 }
 0x4d1   : > { %p3289_p13 = pnand %p3288_p12, %p4525_p8 }
 0x4d2   : > { %p3294_p10 = por %p3293_p4, %p3292_p0 }
 0x4d3   : > { %p3290_p2 = pneg %p3289_p13 }
 0x4d4   : > { %p3296_p9 = por %p3295_p6, %p3294_p10 }
 0x4d6   : > { %p3297_p3 = pnand %p3296_p9, %p3290_p2 }
 0x4d8   : > { %3300 = shalt.err (!%p3297_p3)
}
 0x4d9   : > { %s3408_s19 = smov 128   ;;  %s3409_s4 = smov 8  }
 0x4da   : > { %2697 = dma.vmem_to_hbm [thread:$0]  (%p4525_p8), %s4380_s26, 2048, %s4386_s20, %s2113_s13, %s3408_s19, %s3408_s19, %s3409_s4  }
 0x4db PF: > { %p2742_p7 = scmp.ge.s32.totalorder %s3391_s12, 2  ;;  %s2144_s21 = sand.u32 1, %s3363_s27  }
 0x4dc   : > { %p4526_p5 = scmp.ne.s32.totalorder %s4494_s30, 0  ;;  %s2145_s7 = scalar_lea.sflag [#allocation5], %s2144_s21 }
 0x4de   : > { %p2726_p1 = pnand %p2742_p7, %p4526_p5 }
 0x4e0   : > { %3358 = dma.done.wait (!%p2726_p1), %s2145_s7, 2048  }
 0x4e1   : > { %3360 = vsyncadd (!%p2726_p1), %s2145_s7, 4294965248  ;;  %s30_s12 = sadd.s32 1, %s3391_s12   ;;  %s4527_s16 = sld [smem:[#allocation28_spill]] }
 0x4e2   : > { %p27_p11 = scmp.ge.s32.totalorder %s30_s12, 6   ;;  %s4528_s27 = smov %s3367_s28 }
 0x4e3   : > { %s4529_s28 = smov %s3371_s29  ;;  %s4530_s29 = smov %s3697_s18 }
 0x4e4   : > { %s4531_s30 = smov %s3383_s10  ;;  %s4532_s9 = smov %s3387_s11 }
 0x4e5   : > { %s4533_s10 = smov %s4536_s23  ;;  %29 = sbr.rel (!%p27_p11) target bundleno = 21 (0x15), region = 137 }
 0x4e7   : > { %s4534_s11 = smov %s4527_s16 }
 0x4ec   :  { %2150 = vsyncpa [#allocation4], 1 }
 0x4ed   :  { %2152 = vsyncpa [#allocation4 + $0x1], 1 }
 0x4ee   :  { %2153 = vsyncpa [#allocation7], 1 }
 0x4ef   :  { %2155 = vsyncpa [#allocation7 + $0x1], 1 }
 0x4f0   :  { %2156 = vsyncpa [#allocation10], 1 }
 0x4f1   :  { %2157 = vsyncpa [#allocation13], 1 }
 0x4f2   :  { %2158 = vsyncpa [#allocation16], 1 }
 0x4f3   :  { %2159 = vsyncpa [#allocation5], 1 }
 0x4f4   :  { %2161 = vsyncpa [#allocation5 + $0x1], 1 }

</bundles_post_ra>
